<compile_context>
chip_gen: v7x
topology: tpu7x:2x2x1
jax: 0.10.0
libtpu: 0.0.40
codegen_flags: <defaults>
</compile_context>

<pallas_src>
import functools

import jax
import jax.numpy as jnp
from jax.experimental import pallas as pl
from jax.experimental.pallas import tpu as pltpu


# ------------------------------ fused kernel -------------------------------- #

def _lstm1_kernel(num_layers, seq_len, batch, hidden, *refs):
    """refs = x, wih0_t, whh0_t, bias0, (w_stack_l, bias_l) for l>0, wfc_t, bfc, out.

    x        : (T*B, D_in)  bf16, time-major flattened (row = t*B + b)
    wih0_t   : (D_in, 4H)   bf16
    whh0_t   : (H, 4H)      bf16
    bias0    : (1, 4H)      f32  (b_ih + b_hh)
    w_stack_l: (2H, 4H)     bf16 ([W_ih^l ; W_hh^l] transposed & stacked)
    bias_l   : (1, 4H)      f32
    wfc_t    : (H, O) bf16 ; bfc : (1, O) f32
    out      : (B, O) f32
    """
    T, B, H = seq_len, batch, hidden
    x_ref = refs[0]
    wih0 = refs[1][...]
    whh0 = refs[2][...]
    bias0 = refs[3][...]
    idx = 4
    stacked = []
    for _ in range(num_layers - 1):
        stacked.append((refs[idx][...], refs[idx + 1][...]))
        idx += 2
    wfc = refs[idx][...]
    bfc = refs[idx + 1][...]
    out_ref = refs[idx + 2]

    # Layer-0 input projection for every timestep at once (one MXU pass).
    xp0 = jnp.dot(x_ref[...], wih0, preferred_element_type=jnp.float32) + bias0

    # Per-lane constants for the single-tanh gate trick:
    #   sigmoid(x) = 0.5 * tanh(0.5 * x) + 0.5   on the i/f/o lane blocks,
    #   tanh(x)    = 1.0 * tanh(1.0 * x) + 0.0   on the g lane block.
    lane = jax.lax.broadcasted_iota(jnp.int32, (1, 4 * H), 1)
    is_g = (lane >= 2 * H) & (lane < 3 * H)
    scale = jnp.where(is_g, 1.0, 0.5).astype(jnp.float32)   # (1, 4H)
    offset = jnp.where(is_g, 0.0, 0.5).astype(jnp.float32)  # (1, 4H)

    def cell(g, c):
        # g: (B, 4H) f32 pre-activations (i|f|g|o). One full-vreg tanh.
        act = jnp.tanh(g * scale) * scale + offset
        i_g = act[:, 0 * H:1 * H]
        f_g = act[:, 1 * H:2 * H]
        g_g = act[:, 2 * H:3 * H]
        o_g = act[:, 3 * H:4 * H]
        c_new = f_g * c + i_g * g_g
        h_new = o_g * jnp.tanh(c_new)
        return h_new, c_new

    zeros = jnp.zeros((B, H), jnp.float32)
    h = [zeros] * num_layers
    c = [zeros] * num_layers

    # Wavefront: wave w runs (layer l, time t = w - l) for all valid l.
    # All reads within a wave use the end-of-previous-wave state snapshot.
    for w in range(T + num_layers - 1):
        h_prev = list(h)
        for l in range(num_layers):
            t = w - l
            if t < 0 or t >= T:
                continue
            if l == 0:
                g = xp0[t * B:(t + 1) * B, :] + jnp.dot(
                    h_prev[0].astype(jnp.bfloat16), whh0,
                    preferred_element_type=jnp.float32)
            else:
                w_stack, bias_l = stacked[l - 1]
                lhs = jnp.concatenate([h_prev[l - 1], h_prev[l]],
                                      axis=1).astype(jnp.bfloat16)   # (B, 2H)
                g = jnp.dot(lhs, w_stack,
                            preferred_element_type=jnp.float32) + bias_l
            h[l], c[l] = cell(g, c[l])

    # PyTorch applies ReLU to all timesteps but only out[:, -1, :] reaches the
    # Linear, so fc(relu(h_T)) is exactly equivalent.
    h_last = jnp.maximum(h[num_layers - 1], 0.0).astype(jnp.bfloat16)
    out_ref[...] = jnp.dot(h_last, wfc, preferred_element_type=jnp.float32) + bfc


# ------------------------------- wrappers ----------------------------------- #

def prepare_params(layer_params, fc_w, fc_b):
    """One-time weight prep (outside the jitted forward): transpose to (in,out)
    layout, pre-sum the two LSTM biases, stack [W_ih;W_hh] for layers>0, and
    cast matmul operands to bf16 (biases stay f32)."""
    w_ih0, w_hh0, b_ih0, b_hh0 = layer_params[0]
    prepped = [
        jnp.asarray(w_ih0).T.astype(jnp.bfloat16),                         # (D, 4H)
        jnp.asarray(w_hh0).T.astype(jnp.bfloat16),                         # (H, 4H)
        (jnp.asarray(b_ih0) + jnp.asarray(b_hh0)).reshape(1, -1).astype(jnp.float32),
    ]
    for (w_ih, w_hh, b_ih, b_hh) in layer_params[1:]:
        w_stack = jnp.concatenate([jnp.asarray(w_ih).T, jnp.asarray(w_hh).T],
                                  axis=0)                                  # (2H, 4H)
        prepped.append(w_stack.astype(jnp.bfloat16))
        prepped.append((jnp.asarray(b_ih) + jnp.asarray(b_hh))
                       .reshape(1, -1).astype(jnp.float32))
    prepped.append(jnp.asarray(fc_w).T.astype(jnp.bfloat16))               # (H, O)
    prepped.append(jnp.asarray(fc_b).reshape(1, -1).astype(jnp.float32))   # (1, O)
    return tuple(prepped)


def lstm1_forward(x, prepped, *, num_layers, hidden_size):
    """x: (B, T, D_in) float32, batch_first like PyTorch."""
    B, T, D = x.shape
    out_size = prepped[-1].shape[-1]
    # time-major flattened rows: row index = t*B + b (cheap JAX-side reshape)
    x_flat = jnp.transpose(x, (1, 0, 2)).reshape(T * B, D).astype(jnp.bfloat16)

    kernel = functools.partial(_lstm1_kernel, num_layers, T, B, hidden_size)
    n_in = 1 + 3 + 2 * (num_layers - 1) + 2
    vmem_spec = pl.BlockSpec(memory_space=pltpu.MemorySpace.VMEM)
    return pl.pallas_call(
        kernel,
        out_shape=jax.ShapeDtypeStruct((B, out_size), jnp.float32),
        in_specs=[vmem_spec] * n_in,
        out_specs=vmem_spec,
    )(x_flat, *prepped)


# ------------------------ pure-JAX reference (check) ------------------------ #

def lstm1_reference(x, layer_params, fc_w, fc_b):
    B, T, _ = x.shape
    seq = x
    for (w_ih, w_hh, b_ih, b_hh) in layer_params:
        H = w_hh.shape[1]
        h = jnp.zeros((B, H), jnp.float32)
        c = jnp.zeros((B, H), jnp.float32)
        outs = []
        for t in range(T):
            g = seq[:, t, :] @ w_ih.T + h @ w_hh.T + b_ih + b_hh
            i = jax.nn.sigmoid(g[:, :H])
            f = jax.nn.sigmoid(g[:, H:2 * H])
            gg = jnp.tanh(g[:, 2 * H:3 * H])
            o = jax.nn.sigmoid(g[:, 3 * H:])
            c = f * c + i * gg
            h = o * jnp.tanh(c)
            outs.append(h)
        seq = jnp.stack(outs, axis=1)
    return jnp.maximum(seq[:, -1, :], 0.0) @ fc_w.T + fc_b


# ----------------------------------- main ------------------------------------ #

if __name__ == "__main__":
    INPUT_SIZE, HIDDEN_SIZE, NUM_LAYERS, OUTPUT_SIZE = 16, 32, 2, 4
    B, T = 2, 8

    key = jax.random.PRNGKey(0)
    ks = jax.random.split(key, 4 * NUM_LAYERS + 3)

    def u(k, shape, bound):
        return jax.random.uniform(k, shape, jnp.float32, -bound, bound)

    # PyTorch-style init: U(-1/sqrt(H), 1/sqrt(H)) for LSTM and fc.
    bound = HIDDEN_SIZE ** -0.5
    layer_params = []
    ki = 0
    for l in range(NUM_LAYERS):
        d_in = INPUT_SIZE if l == 0 else HIDDEN_SIZE
        layer_params.append((
            u(ks[ki + 0], (4 * HIDDEN_SIZE, d_in), bound),         # W_ih
            u(ks[ki + 1], (4 * HIDDEN_SIZE, HIDDEN_SIZE), bound),  # W_hh
            u(ks[ki + 2], (4 * HIDDEN_SIZE,), bound),              # b_ih
            u(ks[ki + 3], (4 * HIDDEN_SIZE,), bound),              # b_hh
        ))
        ki += 4
    fc_w = u(ks[ki], (OUTPUT_SIZE, HIDDEN_SIZE), HIDDEN_SIZE ** -0.5)
    fc_b = u(ks[ki + 1], (OUTPUT_SIZE,), HIDDEN_SIZE ** -0.5)
    x = jax.random.normal(ks[ki + 2], (B, T, INPUT_SIZE), jnp.float32)

    prepped = prepare_params(layer_params, fc_w, fc_b)   # once, outside jit

    fwd = jax.jit(functools.partial(lstm1_forward,
                                    num_layers=NUM_LAYERS,
                                    hidden_size=HIDDEN_SIZE))
    out = jax.block_until_ready(fwd(x, prepped))
    ref = jax.block_until_ready(jax.jit(lstm1_reference)(x, layer_params, fc_w, fc_b))

    assert out.shape == (B, OUTPUT_SIZE), out.shape
    assert jnp.allclose(out, ref, rtol=2e-2, atol=2e-2), (out, ref)
    print("KERNEL_OK")
</pallas_src>

<mosaic_0001>
module attributes {stable_mosaic.version = 11 : i64} {
  func.func @_lstm1_kernel(%arg0: memref<16x16xbf16, #tpu.memory_space<vmem>>, %arg1: memref<16x128xbf16, #tpu.memory_space<vmem>>, %arg2: memref<32x128xbf16, #tpu.memory_space<vmem>>, %arg3: memref<1x128xf32, #tpu.memory_space<vmem>>, %arg4: memref<64x128xbf16, #tpu.memory_space<vmem>>, %arg5: memref<1x128xf32, #tpu.memory_space<vmem>>, %arg6: memref<32x4xbf16, #tpu.memory_space<vmem>>, %arg7: memref<1x4xf32, #tpu.memory_space<vmem>>, %arg8: memref<2x4xf32, #tpu.memory_space<vmem>>) attributes {dimension_semantics = [], scalar_prefetch = 0 : i64, scratch_operands = 0 : i64, tpu.core_type = #tpu.core_type<tc>} {
    %c0 = arith.constant 0 : index
    %c0_0 = arith.constant 0 : index
    %0 = vector.load %arg1[%c0, %c0_0] : memref<16x128xbf16, #tpu.memory_space<vmem>>, vector<16x128xbf16>
    %c0_1 = arith.constant 0 : index
    %c0_2 = arith.constant 0 : index
    %1 = vector.load %arg2[%c0_1, %c0_2] : memref<32x128xbf16, #tpu.memory_space<vmem>>, vector<32x128xbf16>
    %c0_3 = arith.constant 0 : index
    %c0_4 = arith.constant 0 : index
    %2 = vector.load %arg3[%c0_3, %c0_4] : memref<1x128xf32, #tpu.memory_space<vmem>>, vector<1x128xf32>
    %c0_5 = arith.constant 0 : index
    %c0_6 = arith.constant 0 : index
    %3 = vector.load %arg4[%c0_5, %c0_6] : memref<64x128xbf16, #tpu.memory_space<vmem>>, vector<64x128xbf16>
    %c0_7 = arith.constant 0 : index
    %c0_8 = arith.constant 0 : index
    %4 = vector.load %arg5[%c0_7, %c0_8] : memref<1x128xf32, #tpu.memory_space<vmem>>, vector<1x128xf32>
    %c0_9 = arith.constant 0 : index
    %c0_10 = arith.constant 0 : index
    %5 = vector.load %arg6[%c0_9, %c0_10] : memref<32x4xbf16, #tpu.memory_space<vmem>>, vector<32x4xbf16>
    %c0_11 = arith.constant 0 : index
    %c0_12 = arith.constant 0 : index
    %6 = vector.load %arg7[%c0_11, %c0_12] : memref<1x4xf32, #tpu.memory_space<vmem>>, vector<1x4xf32>
    %c0_13 = arith.constant 0 : index
    %c0_14 = arith.constant 0 : index
    %7 = vector.load %arg0[%c0_13, %c0_14] : memref<16x16xbf16, #tpu.memory_space<vmem>>, vector<16x16xbf16>
    %cst = arith.constant dense<0.000000e+00> : vector<16x128xf32>
    %8 = tpu.matmul %7, %0, %cst {dimension_numbers = #tpu.dot_dimension_numbers<[1], [0], [0], [1], [0, 0, 1, 1], [], []>} : vector<16x16xbf16>, vector<16x128xbf16>, vector<16x128xf32> -> vector<16x128xf32>
    %9 = vector.broadcast %2 : vector<1x128xf32> to vector<16x128xf32>
    %10 = arith.addf %8, %9 : vector<16x128xf32>
    %11 = tpu.iota {dimensions = array<i32: 1>} : vector<1x128xi32>
    %c64_i32 = arith.constant 64 : i32
    %12 = vector.broadcast %c64_i32 : i32 to vector<1x128xi32>
    %13 = arith.cmpi sge, %11, %12 : vector<1x128xi32>
    %c96_i32 = arith.constant 96 : i32
    %14 = vector.broadcast %c96_i32 : i32 to vector<1x128xi32>
    %15 = arith.cmpi slt, %11, %14 : vector<1x128xi32>
    %16 = arith.andi %13, %15 : vector<1x128xi1>
    %cst_15 = arith.constant 1.000000e+00 : f32
    %cst_16 = arith.constant 5.000000e-01 : f32
    %17 = vector.broadcast %cst_15 : f32 to vector<1x128xf32>
    %18 = vector.broadcast %cst_16 : f32 to vector<1x128xf32>
    %19 = arith.select %16, %17, %18 : vector<1x128xi1>, vector<1x128xf32>
    %cst_17 = arith.constant 0.000000e+00 : f32
    %cst_18 = arith.constant 5.000000e-01 : f32
    %20 = vector.broadcast %cst_17 : f32 to vector<1x128xf32>
    %21 = vector.broadcast %cst_18 : f32 to vector<1x128xf32>
    %22 = arith.select %16, %20, %21 : vector<1x128xi1>, vector<1x128xf32>
    %cst_19 = arith.constant 0.000000e+00 : f32
    %23 = vector.broadcast %cst_19 : f32 to vector<2x32xf32>
    %24 = vector.extract_strided_slice %10 {offsets = [0, 0], sizes = [2, 128], strides = [1, 1]} : vector<16x128xf32> to vector<2x128xf32>
    %25 = arith.truncf %23 : vector<2x32xf32> to vector<2x32xbf16>
    %cst_20 = arith.constant dense<0.000000e+00> : vector<2x128xf32>
    %26 = tpu.matmul %25, %1, %cst_20 {dimension_numbers = #tpu.dot_dimension_numbers<[1], [0], [0], [1], [0, 0, 1, 1], [], []>} : vector<2x32xbf16>, vector<32x128xbf16>, vector<2x128xf32> -> vector<2x128xf32>
    %27 = arith.addf %24, %26 : vector<2x128xf32>
    %28 = vector.broadcast %19 : vector<1x128xf32> to vector<2x128xf32>
    %29 = arith.mulf %27, %28 : vector<2x128xf32>
    %30 = math.tanh %29 : vector<2x128xf32>
    %31 = vector.broadcast %19 : vector<1x128xf32> to vector<2x128xf32>
    %32 = arith.mulf %30, %31 : vector<2x128xf32>
    %33 = vector.broadcast %22 : vector<1x128xf32> to vector<2x128xf32>
    %34 = arith.addf %32, %33 : vector<2x128xf32>
    %35 = vector.extract_strided_slice %34 {offsets = [0, 0], sizes = [2, 32], strides = [1, 1]} : vector<2x128xf32> to vector<2x32xf32>
    %36 = vector.extract_strided_slice %34 {offsets = [0, 32], sizes = [2, 32], strides = [1, 1]} : vector<2x128xf32> to vector<2x32xf32>
    %37 = vector.extract_strided_slice %34 {offsets = [0, 64], sizes = [2, 32], strides = [1, 1]} : vector<2x128xf32> to vector<2x32xf32>
    %38 = vector.extract_strided_slice %34 {offsets = [0, 96], sizes = [2, 32], strides = [1, 1]} : vector<2x128xf32> to vector<2x32xf32>
    %39 = arith.mulf %36, %23 : vector<2x32xf32>
    %40 = arith.mulf %35, %37 : vector<2x32xf32>
    %41 = arith.addf %39, %40 : vector<2x32xf32>
    %42 = math.tanh %41 : vector<2x32xf32>
    %43 = arith.mulf %38, %42 : vector<2x32xf32>
    %44 = vector.extract_strided_slice %10 {offsets = [2, 0], sizes = [2, 128], strides = [1, 1]} : vector<16x128xf32> to vector<2x128xf32>
    %45 = arith.truncf %43 : vector<2x32xf32> to vector<2x32xbf16>
    %cst_21 = arith.constant dense<0.000000e+00> : vector<2x128xf32>
    %46 = tpu.matmul %45, %1, %cst_21 {dimension_numbers = #tpu.dot_dimension_numbers<[1], [0], [0], [1], [0, 0, 1, 1], [], []>} : vector<2x32xbf16>, vector<32x128xbf16>, vector<2x128xf32> -> vector<2x128xf32>
    %47 = arith.addf %44, %46 : vector<2x128xf32>
    %48 = vector.broadcast %19 : vector<1x128xf32> to vector<2x128xf32>
    %49 = arith.mulf %47, %48 : vector<2x128xf32>
    %50 = math.tanh %49 : vector<2x128xf32>
    %51 = vector.broadcast %19 : vector<1x128xf32> to vector<2x128xf32>
    %52 = arith.mulf %50, %51 : vector<2x128xf32>
    %53 = vector.broadcast %22 : vector<1x128xf32> to vector<2x128xf32>
    %54 = arith.addf %52, %53 : vector<2x128xf32>
    %55 = vector.extract_strided_slice %54 {offsets = [0, 0], sizes = [2, 32], strides = [1, 1]} : vector<2x128xf32> to vector<2x32xf32>
    %56 = vector.extract_strided_slice %54 {offsets = [0, 32], sizes = [2, 32], strides = [1, 1]} : vector<2x128xf32> to vector<2x32xf32>
    %57 = vector.extract_strided_slice %54 {offsets = [0, 64], sizes = [2, 32], strides = [1, 1]} : vector<2x128xf32> to vector<2x32xf32>
    %58 = vector.extract_strided_slice %54 {offsets = [0, 96], sizes = [2, 32], strides = [1, 1]} : vector<2x128xf32> to vector<2x32xf32>
    %59 = arith.mulf %56, %41 : vector<2x32xf32>
    %60 = arith.mulf %55, %57 : vector<2x32xf32>
    %61 = arith.addf %59, %60 : vector<2x32xf32>
    %62 = math.tanh %61 : vector<2x32xf32>
    %63 = arith.mulf %58, %62 : vector<2x32xf32>
    %64 = tpu.concatenate %43, %23 in 1 : vector<2x32xf32>, vector<2x32xf32> -> vector<2x64xf32>
    %65 = arith.truncf %64 : vector<2x64xf32> to vector<2x64xbf16>
    %cst_22 = arith.constant dense<0.000000e+00> : vector<2x128xf32>
    %66 = tpu.matmul %65, %3, %cst_22 {dimension_numbers = #tpu.dot_dimension_numbers<[1], [0], [0], [1], [0, 0, 1, 1], [], []>} : vector<2x64xbf16>, vector<64x128xbf16>, vector<2x128xf32> -> vector<2x128xf32>
    %67 = vector.broadcast %4 : vector<1x128xf32> to vector<2x128xf32>
    %68 = arith.addf %66, %67 : vector<2x128xf32>
    %69 = vector.broadcast %19 : vector<1x128xf32> to vector<2x128xf32>
    %70 = arith.mulf %68, %69 : vector<2x128xf32>
    %71 = math.tanh %70 : vector<2x128xf32>
    %72 = vector.broadcast %19 : vector<1x128xf32> to vector<2x128xf32>
    %73 = arith.mulf %71, %72 : vector<2x128xf32>
    %74 = vector.broadcast %22 : vector<1x128xf32> to vector<2x128xf32>
    %75 = arith.addf %73, %74 : vector<2x128xf32>
    %76 = vector.extract_strided_slice %75 {offsets = [0, 0], sizes = [2, 32], strides = [1, 1]} : vector<2x128xf32> to vector<2x32xf32>
    %77 = vector.extract_strided_slice %75 {offsets = [0, 32], sizes = [2, 32], strides = [1, 1]} : vector<2x128xf32> to vector<2x32xf32>
    %78 = vector.extract_strided_slice %75 {offsets = [0, 64], sizes = [2, 32], strides = [1, 1]} : vector<2x128xf32> to vector<2x32xf32>
    %79 = vector.extract_strided_slice %75 {offsets = [0, 96], sizes = [2, 32], strides = [1, 1]} : vector<2x128xf32> to vector<2x32xf32>
    %80 = arith.mulf %77, %23 : vector<2x32xf32>
    %81 = arith.mulf %76, %78 : vector<2x32xf32>
    %82 = arith.addf %80, %81 : vector<2x32xf32>
    %83 = math.tanh %82 : vector<2x32xf32>
    %84 = arith.mulf %79, %83 : vector<2x32xf32>
    %85 = vector.extract_strided_slice %10 {offsets = [4, 0], sizes = [2, 128], strides = [1, 1]} : vector<16x128xf32> to vector<2x128xf32>
    %86 = arith.truncf %63 : vector<2x32xf32> to vector<2x32xbf16>
    %cst_23 = arith.constant dense<0.000000e+00> : vector<2x128xf32>
    %87 = tpu.matmul %86, %1, %cst_23 {dimension_numbers = #tpu.dot_dimension_numbers<[1], [0], [0], [1], [0, 0, 1, 1], [], []>} : vector<2x32xbf16>, vector<32x128xbf16>, vector<2x128xf32> -> vector<2x128xf32>
    %88 = arith.addf %85, %87 : vector<2x128xf32>
    %89 = vector.broadcast %19 : vector<1x128xf32> to vector<2x128xf32>
    %90 = arith.mulf %88, %89 : vector<2x128xf32>
    %91 = math.tanh %90 : vector<2x128xf32>
    %92 = vector.broadcast %19 : vector<1x128xf32> to vector<2x128xf32>
    %93 = arith.mulf %91, %92 : vector<2x128xf32>
    %94 = vector.broadcast %22 : vector<1x128xf32> to vector<2x128xf32>
    %95 = arith.addf %93, %94 : vector<2x128xf32>
    %96 = vector.extract_strided_slice %95 {offsets = [0, 0], sizes = [2, 32], strides = [1, 1]} : vector<2x128xf32> to vector<2x32xf32>
    %97 = vector.extract_strided_slice %95 {offsets = [0, 32], sizes = [2, 32], strides = [1, 1]} : vector<2x128xf32> to vector<2x32xf32>
    %98 = vector.extract_strided_slice %95 {offsets = [0, 64], sizes = [2, 32], strides = [1, 1]} : vector<2x128xf32> to vector<2x32xf32>
    %99 = vector.extract_strided_slice %95 {offsets = [0, 96], sizes = [2, 32], strides = [1, 1]} : vector<2x128xf32> to vector<2x32xf32>
    %100 = arith.mulf %97, %61 : vector<2x32xf32>
    %101 = arith.mulf %96, %98 : vector<2x32xf32>
    %102 = arith.addf %100, %101 : vector<2x32xf32>
    %103 = math.tanh %102 : vector<2x32xf32>
    %104 = arith.mulf %99, %103 : vector<2x32xf32>
    %105 = tpu.concatenate %63, %84 in 1 : vector<2x32xf32>, vector<2x32xf32> -> vector<2x64xf32>
    %106 = arith.truncf %105 : vector<2x64xf32> to vector<2x64xbf16>
    %cst_24 = arith.constant dense<0.000000e+00> : vector<2x128xf32>
    %107 = tpu.matmul %106, %3, %cst_24 {dimension_numbers = #tpu.dot_dimension_numbers<[1], [0], [0], [1], [0, 0, 1, 1], [], []>} : vector<2x64xbf16>, vector<64x128xbf16>, vector<2x128xf32> -> vector<2x128xf32>
    %108 = vector.broadcast %4 : vector<1x128xf32> to vector<2x128xf32>
    %109 = arith.addf %107, %108 : vector<2x128xf32>
    %110 = vector.broadcast %19 : vector<1x128xf32> to vector<2x128xf32>
    %111 = arith.mulf %109, %110 : vector<2x128xf32>
    %112 = math.tanh %111 : vector<2x128xf32>
    %113 = vector.broadcast %19 : vector<1x128xf32> to vector<2x128xf32>
    %114 = arith.mulf %112, %113 : vector<2x128xf32>
    %115 = vector.broadcast %22 : vector<1x128xf32> to vector<2x128xf32>
    %116 = arith.addf %114, %115 : vector<2x128xf32>
    %117 = vector.extract_strided_slice %116 {offsets = [0, 0], sizes = [2, 32], strides = [1, 1]} : vector<2x128xf32> to vector<2x32xf32>
    %118 = vector.extract_strided_slice %116 {offsets = [0, 32], sizes = [2, 32], strides = [1, 1]} : vector<2x128xf32> to vector<2x32xf32>
    %119 = vector.extract_strided_slice %116 {offsets = [0, 64], sizes = [2, 32], strides = [1, 1]} : vector<2x128xf32> to vector<2x32xf32>
    %120 = vector.extract_strided_slice %116 {offsets = [0, 96], sizes = [2, 32], strides = [1, 1]} : vector<2x128xf32> to vector<2x32xf32>
    %121 = arith.mulf %118, %82 : vector<2x32xf32>
    %122 = arith.mulf %117, %119 : vector<2x32xf32>
    %123 = arith.addf %121, %122 : vector<2x32xf32>
    %124 = math.tanh %123 : vector<2x32xf32>
    %125 = arith.mulf %120, %124 : vector<2x32xf32>
    %126 = vector.extract_strided_slice %10 {offsets = [6, 0], sizes = [2, 128], strides = [1, 1]} : vector<16x128xf32> to vector<2x128xf32>
    %127 = arith.truncf %104 : vector<2x32xf32> to vector<2x32xbf16>
    %cst_25 = arith.constant dense<0.000000e+00> : vector<2x128xf32>
    %128 = tpu.matmul %127, %1, %cst_25 {dimension_numbers = #tpu.dot_dimension_numbers<[1], [0], [0], [1], [0, 0, 1, 1], [], []>} : vector<2x32xbf16>, vector<32x128xbf16>, vector<2x128xf32> -> vector<2x128xf32>
    %129 = arith.addf %126, %128 : vector<2x128xf32>
    %130 = vector.broadcast %19 : vector<1x128xf32> to vector<2x128xf32>
    %131 = arith.mulf %129, %130 : vector<2x128xf32>
    %132 = math.tanh %131 : vector<2x128xf32>
    %133 = vector.broadcast %19 : vector<1x128xf32> to vector<2x128xf32>
    %134 = arith.mulf %132, %133 : vector<2x128xf32>
    %135 = vector.broadcast %22 : vector<1x128xf32> to vector<2x128xf32>
    %136 = arith.addf %134, %135 : vector<2x128xf32>
    %137 = vector.extract_strided_slice %136 {offsets = [0, 0], sizes = [2, 32], strides = [1, 1]} : vector<2x128xf32> to vector<2x32xf32>
    %138 = vector.extract_strided_slice %136 {offsets = [0, 32], sizes = [2, 32], strides = [1, 1]} : vector<2x128xf32> to vector<2x32xf32>
    %139 = vector.extract_strided_slice %136 {offsets = [0, 64], sizes = [2, 32], strides = [1, 1]} : vector<2x128xf32> to vector<2x32xf32>
    %140 = vector.extract_strided_slice %136 {offsets = [0, 96], sizes = [2, 32], strides = [1, 1]} : vector<2x128xf32> to vector<2x32xf32>
    %141 = arith.mulf %138, %102 : vector<2x32xf32>
    %142 = arith.mulf %137, %139 : vector<2x32xf32>
    %143 = arith.addf %141, %142 : vector<2x32xf32>
    %144 = math.tanh %143 : vector<2x32xf32>
    %145 = arith.mulf %140, %144 : vector<2x32xf32>
    %146 = tpu.concatenate %104, %125 in 1 : vector<2x32xf32>, vector<2x32xf32> -> vector<2x64xf32>
    %147 = arith.truncf %146 : vector<2x64xf32> to vector<2x64xbf16>
    %cst_26 = arith.constant dense<0.000000e+00> : vector<2x128xf32>
    %148 = tpu.matmul %147, %3, %cst_26 {dimension_numbers = #tpu.dot_dimension_numbers<[1], [0], [0], [1], [0, 0, 1, 1], [], []>} : vector<2x64xbf16>, vector<64x128xbf16>, vector<2x128xf32> -> vector<2x128xf32>
    %149 = vector.broadcast %4 : vector<1x128xf32> to vector<2x128xf32>
    %150 = arith.addf %148, %149 : vector<2x128xf32>
    %151 = vector.broadcast %19 : vector<1x128xf32> to vector<2x128xf32>
    %152 = arith.mulf %150, %151 : vector<2x128xf32>
    %153 = math.tanh %152 : vector<2x128xf32>
    %154 = vector.broadcast %19 : vector<1x128xf32> to vector<2x128xf32>
    %155 = arith.mulf %153, %154 : vector<2x128xf32>
    %156 = vector.broadcast %22 : vector<1x128xf32> to vector<2x128xf32>
    %157 = arith.addf %155, %156 : vector<2x128xf32>
    %158 = vector.extract_strided_slice %157 {offsets = [0, 0], sizes = [2, 32], strides = [1, 1]} : vector<2x128xf32> to vector<2x32xf32>
    %159 = vector.extract_strided_slice %157 {offsets = [0, 32], sizes = [2, 32], strides = [1, 1]} : vector<2x128xf32> to vector<2x32xf32>
    %160 = vector.extract_strided_slice %157 {offsets = [0, 64], sizes = [2, 32], strides = [1, 1]} : vector<2x128xf32> to vector<2x32xf32>
    %161 = vector.extract_strided_slice %157 {offsets = [0, 96], sizes = [2, 32], strides = [1, 1]} : vector<2x128xf32> to vector<2x32xf32>
    %162 = arith.mulf %159, %123 : vector<2x32xf32>
    %163 = arith.mulf %158, %160 : vector<2x32xf32>
    %164 = arith.addf %162, %163 : vector<2x32xf32>
    %165 = math.tanh %164 : vector<2x32xf32>
    %166 = arith.mulf %161, %165 : vector<2x32xf32>
    %167 = vector.extract_strided_slice %10 {offsets = [8, 0], sizes = [2, 128], strides = [1, 1]} : vector<16x128xf32> to vector<2x128xf32>
    %168 = arith.truncf %145 : vector<2x32xf32> to vector<2x32xbf16>
    %cst_27 = arith.constant dense<0.000000e+00> : vector<2x128xf32>
    %169 = tpu.matmul %168, %1, %cst_27 {dimension_numbers = #tpu.dot_dimension_numbers<[1], [0], [0], [1], [0, 0, 1, 1], [], []>} : vector<2x32xbf16>, vector<32x128xbf16>, vector<2x128xf32> -> vector<2x128xf32>
    %170 = arith.addf %167, %169 : vector<2x128xf32>
    %171 = vector.broadcast %19 : vector<1x128xf32> to vector<2x128xf32>
    %172 = arith.mulf %170, %171 : vector<2x128xf32>
    %173 = math.tanh %172 : vector<2x128xf32>
    %174 = vector.broadcast %19 : vector<1x128xf32> to vector<2x128xf32>
    %175 = arith.mulf %173, %174 : vector<2x128xf32>
    %176 = vector.broadcast %22 : vector<1x128xf32> to vector<2x128xf32>
    %177 = arith.addf %175, %176 : vector<2x128xf32>
    %178 = vector.extract_strided_slice %177 {offsets = [0, 0], sizes = [2, 32], strides = [1, 1]} : vector<2x128xf32> to vector<2x32xf32>
    %179 = vector.extract_strided_slice %177 {offsets = [0, 32], sizes = [2, 32], strides = [1, 1]} : vector<2x128xf32> to vector<2x32xf32>
    %180 = vector.extract_strided_slice %177 {offsets = [0, 64], sizes = [2, 32], strides = [1, 1]} : vector<2x128xf32> to vector<2x32xf32>
    %181 = vector.extract_strided_slice %177 {offsets = [0, 96], sizes = [2, 32], strides = [1, 1]} : vector<2x128xf32> to vector<2x32xf32>
    %182 = arith.mulf %179, %143 : vector<2x32xf32>
    %183 = arith.mulf %178, %180 : vector<2x32xf32>
    %184 = arith.addf %182, %183 : vector<2x32xf32>
    %185 = math.tanh %184 : vector<2x32xf32>
    %186 = arith.mulf %181, %185 : vector<2x32xf32>
    %187 = tpu.concatenate %145, %166 in 1 : vector<2x32xf32>, vector<2x32xf32> -> vector<2x64xf32>
    %188 = arith.truncf %187 : vector<2x64xf32> to vector<2x64xbf16>
    %cst_28 = arith.constant dense<0.000000e+00> : vector<2x128xf32>
    %189 = tpu.matmul %188, %3, %cst_28 {dimension_numbers = #tpu.dot_dimension_numbers<[1], [0], [0], [1], [0, 0, 1, 1], [], []>} : vector<2x64xbf16>, vector<64x128xbf16>, vector<2x128xf32> -> vector<2x128xf32>
    %190 = vector.broadcast %4 : vector<1x128xf32> to vector<2x128xf32>
    %191 = arith.addf %189, %190 : vector<2x128xf32>
    %192 = vector.broadcast %19 : vector<1x128xf32> to vector<2x128xf32>
    %193 = arith.mulf %191, %192 : vector<2x128xf32>
    %194 = math.tanh %193 : vector<2x128xf32>
    %195 = vector.broadcast %19 : vector<1x128xf32> to vector<2x128xf32>
    %196 = arith.mulf %194, %195 : vector<2x128xf32>
    %197 = vector.broadcast %22 : vector<1x128xf32> to vector<2x128xf32>
    %198 = arith.addf %196, %197 : vector<2x128xf32>
    %199 = vector.extract_strided_slice %198 {offsets = [0, 0], sizes = [2, 32], strides = [1, 1]} : vector<2x128xf32> to vector<2x32xf32>
    %200 = vector.extract_strided_slice %198 {offsets = [0, 32], sizes = [2, 32], strides = [1, 1]} : vector<2x128xf32> to vector<2x32xf32>
    %201 = vector.extract_strided_slice %198 {offsets = [0, 64], sizes = [2, 32], strides = [1, 1]} : vector<2x128xf32> to vector<2x32xf32>
    %202 = vector.extract_strided_slice %198 {offsets = [0, 96], sizes = [2, 32], strides = [1, 1]} : vector<2x128xf32> to vector<2x32xf32>
    %203 = arith.mulf %200, %164 : vector<2x32xf32>
    %204 = arith.mulf %199, %201 : vector<2x32xf32>
    %205 = arith.addf %203, %204 : vector<2x32xf32>
    %206 = math.tanh %205 : vector<2x32xf32>
    %207 = arith.mulf %202, %206 : vector<2x32xf32>
    %208 = vector.extract_strided_slice %10 {offsets = [10, 0], sizes = [2, 128], strides = [1, 1]} : vector<16x128xf32> to vector<2x128xf32>
    %209 = arith.truncf %186 : vector<2x32xf32> to vector<2x32xbf16>
    %cst_29 = arith.constant dense<0.000000e+00> : vector<2x128xf32>
    %210 = tpu.matmul %209, %1, %cst_29 {dimension_numbers = #tpu.dot_dimension_numbers<[1], [0], [0], [1], [0, 0, 1, 1], [], []>} : vector<2x32xbf16>, vector<32x128xbf16>, vector<2x128xf32> -> vector<2x128xf32>
    %211 = arith.addf %208, %210 : vector<2x128xf32>
    %212 = vector.broadcast %19 : vector<1x128xf32> to vector<2x128xf32>
    %213 = arith.mulf %211, %212 : vector<2x128xf32>
    %214 = math.tanh %213 : vector<2x128xf32>
    %215 = vector.broadcast %19 : vector<1x128xf32> to vector<2x128xf32>
    %216 = arith.mulf %214, %215 : vector<2x128xf32>
    %217 = vector.broadcast %22 : vector<1x128xf32> to vector<2x128xf32>
    %218 = arith.addf %216, %217 : vector<2x128xf32>
    %219 = vector.extract_strided_slice %218 {offsets = [0, 0], sizes = [2, 32], strides = [1, 1]} : vector<2x128xf32> to vector<2x32xf32>
    %220 = vector.extract_strided_slice %218 {offsets = [0, 32], sizes = [2, 32], strides = [1, 1]} : vector<2x128xf32> to vector<2x32xf32>
    %221 = vector.extract_strided_slice %218 {offsets = [0, 64], sizes = [2, 32], strides = [1, 1]} : vector<2x128xf32> to vector<2x32xf32>
    %222 = vector.extract_strided_slice %218 {offsets = [0, 96], sizes = [2, 32], strides = [1, 1]} : vector<2x128xf32> to vector<2x32xf32>
    %223 = arith.mulf %220, %184 : vector<2x32xf32>
    %224 = arith.mulf %219, %221 : vector<2x32xf32>
    %225 = arith.addf %223, %224 : vector<2x32xf32>
    %226 = math.tanh %225 : vector<2x32xf32>
    %227 = arith.mulf %222, %226 : vector<2x32xf32>
    %228 = tpu.concatenate %186, %207 in 1 : vector<2x32xf32>, vector<2x32xf32> -> vector<2x64xf32>
    %229 = arith.truncf %228 : vector<2x64xf32> to vector<2x64xbf16>
    %cst_30 = arith.constant dense<0.000000e+00> : vector<2x128xf32>
    %230 = tpu.matmul %229, %3, %cst_30 {dimension_numbers = #tpu.dot_dimension_numbers<[1], [0], [0], [1], [0, 0, 1, 1], [], []>} : vector<2x64xbf16>, vector<64x128xbf16>, vector<2x128xf32> -> vector<2x128xf32>
    %231 = vector.broadcast %4 : vector<1x128xf32> to vector<2x128xf32>
    %232 = arith.addf %230, %231 : vector<2x128xf32>
    %233 = vector.broadcast %19 : vector<1x128xf32> to vector<2x128xf32>
    %234 = arith.mulf %232, %233 : vector<2x128xf32>
    %235 = math.tanh %234 : vector<2x128xf32>
    %236 = vector.broadcast %19 : vector<1x128xf32> to vector<2x128xf32>
    %237 = arith.mulf %235, %236 : vector<2x128xf32>
    %238 = vector.broadcast %22 : vector<1x128xf32> to vector<2x128xf32>
    %239 = arith.addf %237, %238 : vector<2x128xf32>
    %240 = vector.extract_strided_slice %239 {offsets = [0, 0], sizes = [2, 32], strides = [1, 1]} : vector<2x128xf32> to vector<2x32xf32>
    %241 = vector.extract_strided_slice %239 {offsets = [0, 32], sizes = [2, 32], strides = [1, 1]} : vector<2x128xf32> to vector<2x32xf32>
    %242 = vector.extract_strided_slice %239 {offsets = [0, 64], sizes = [2, 32], strides = [1, 1]} : vector<2x128xf32> to vector<2x32xf32>
    %243 = vector.extract_strided_slice %239 {offsets = [0, 96], sizes = [2, 32], strides = [1, 1]} : vector<2x128xf32> to vector<2x32xf32>
    %244 = arith.mulf %241, %205 : vector<2x32xf32>
    %245 = arith.mulf %240, %242 : vector<2x32xf32>
    %246 = arith.addf %244, %245 : vector<2x32xf32>
    %247 = math.tanh %246 : vector<2x32xf32>
    %248 = arith.mulf %243, %247 : vector<2x32xf32>
    %249 = vector.extract_strided_slice %10 {offsets = [12, 0], sizes = [2, 128], strides = [1, 1]} : vector<16x128xf32> to vector<2x128xf32>
    %250 = arith.truncf %227 : vector<2x32xf32> to vector<2x32xbf16>
    %cst_31 = arith.constant dense<0.000000e+00> : vector<2x128xf32>
    %251 = tpu.matmul %250, %1, %cst_31 {dimension_numbers = #tpu.dot_dimension_numbers<[1], [0], [0], [1], [0, 0, 1, 1], [], []>} : vector<2x32xbf16>, vector<32x128xbf16>, vector<2x128xf32> -> vector<2x128xf32>
    %252 = arith.addf %249, %251 : vector<2x128xf32>
    %253 = vector.broadcast %19 : vector<1x128xf32> to vector<2x128xf32>
    %254 = arith.mulf %252, %253 : vector<2x128xf32>
    %255 = math.tanh %254 : vector<2x128xf32>
    %256 = vector.broadcast %19 : vector<1x128xf32> to vector<2x128xf32>
    %257 = arith.mulf %255, %256 : vector<2x128xf32>
    %258 = vector.broadcast %22 : vector<1x128xf32> to vector<2x128xf32>
    %259 = arith.addf %257, %258 : vector<2x128xf32>
    %260 = vector.extract_strided_slice %259 {offsets = [0, 0], sizes = [2, 32], strides = [1, 1]} : vector<2x128xf32> to vector<2x32xf32>
    %261 = vector.extract_strided_slice %259 {offsets = [0, 32], sizes = [2, 32], strides = [1, 1]} : vector<2x128xf32> to vector<2x32xf32>
    %262 = vector.extract_strided_slice %259 {offsets = [0, 64], sizes = [2, 32], strides = [1, 1]} : vector<2x128xf32> to vector<2x32xf32>
    %263 = vector.extract_strided_slice %259 {offsets = [0, 96], sizes = [2, 32], strides = [1, 1]} : vector<2x128xf32> to vector<2x32xf32>
    %264 = arith.mulf %261, %225 : vector<2x32xf32>
    %265 = arith.mulf %260, %262 : vector<2x32xf32>
    %266 = arith.addf %264, %265 : vector<2x32xf32>
    %267 = math.tanh %266 : vector<2x32xf32>
    %268 = arith.mulf %263, %267 : vector<2x32xf32>
    %269 = tpu.concatenate %227, %248 in 1 : vector<2x32xf32>, vector<2x32xf32> -> vector<2x64xf32>
    %270 = arith.truncf %269 : vector<2x64xf32> to vector<2x64xbf16>
    %cst_32 = arith.constant dense<0.000000e+00> : vector<2x128xf32>
    %271 = tpu.matmul %270, %3, %cst_32 {dimension_numbers = #tpu.dot_dimension_numbers<[1], [0], [0], [1], [0, 0, 1, 1], [], []>} : vector<2x64xbf16>, vector<64x128xbf16>, vector<2x128xf32> -> vector<2x128xf32>
    %272 = vector.broadcast %4 : vector<1x128xf32> to vector<2x128xf32>
    %273 = arith.addf %271, %272 : vector<2x128xf32>
    %274 = vector.broadcast %19 : vector<1x128xf32> to vector<2x128xf32>
    %275 = arith.mulf %273, %274 : vector<2x128xf32>
    %276 = math.tanh %275 : vector<2x128xf32>
    %277 = vector.broadcast %19 : vector<1x128xf32> to vector<2x128xf32>
    %278 = arith.mulf %276, %277 : vector<2x128xf32>
    %279 = vector.broadcast %22 : vector<1x128xf32> to vector<2x128xf32>
    %280 = arith.addf %278, %279 : vector<2x128xf32>
    %281 = vector.extract_strided_slice %280 {offsets = [0, 0], sizes = [2, 32], strides = [1, 1]} : vector<2x128xf32> to vector<2x32xf32>
    %282 = vector.extract_strided_slice %280 {offsets = [0, 32], sizes = [2, 32], strides = [1, 1]} : vector<2x128xf32> to vector<2x32xf32>
    %283 = vector.extract_strided_slice %280 {offsets = [0, 64], sizes = [2, 32], strides = [1, 1]} : vector<2x128xf32> to vector<2x32xf32>
    %284 = vector.extract_strided_slice %280 {offsets = [0, 96], sizes = [2, 32], strides = [1, 1]} : vector<2x128xf32> to vector<2x32xf32>
    %285 = arith.mulf %282, %246 : vector<2x32xf32>
    %286 = arith.mulf %281, %283 : vector<2x32xf32>
    %287 = arith.addf %285, %286 : vector<2x32xf32>
    %288 = math.tanh %287 : vector<2x32xf32>
    %289 = arith.mulf %284, %288 : vector<2x32xf32>
    %290 = vector.extract_strided_slice %10 {offsets = [14, 0], sizes = [2, 128], strides = [1, 1]} : vector<16x128xf32> to vector<2x128xf32>
    %291 = arith.truncf %268 : vector<2x32xf32> to vector<2x32xbf16>
    %cst_33 = arith.constant dense<0.000000e+00> : vector<2x128xf32>
    %292 = tpu.matmul %291, %1, %cst_33 {dimension_numbers = #tpu.dot_dimension_numbers<[1], [0], [0], [1], [0, 0, 1, 1], [], []>} : vector<2x32xbf16>, vector<32x128xbf16>, vector<2x128xf32> -> vector<2x128xf32>
    %293 = arith.addf %290, %292 : vector<2x128xf32>
    %294 = vector.broadcast %19 : vector<1x128xf32> to vector<2x128xf32>
    %295 = arith.mulf %293, %294 : vector<2x128xf32>
    %296 = math.tanh %295 : vector<2x128xf32>
    %297 = vector.broadcast %19 : vector<1x128xf32> to vector<2x128xf32>
    %298 = arith.mulf %296, %297 : vector<2x128xf32>
    %299 = vector.broadcast %22 : vector<1x128xf32> to vector<2x128xf32>
    %300 = arith.addf %298, %299 : vector<2x128xf32>
    %301 = vector.extract_strided_slice %300 {offsets = [0, 0], sizes = [2, 32], strides = [1, 1]} : vector<2x128xf32> to vector<2x32xf32>
    %302 = vector.extract_strided_slice %300 {offsets = [0, 32], sizes = [2, 32], strides = [1, 1]} : vector<2x128xf32> to vector<2x32xf32>
    %303 = vector.extract_strided_slice %300 {offsets = [0, 64], sizes = [2, 32], strides = [1, 1]} : vector<2x128xf32> to vector<2x32xf32>
    %304 = vector.extract_strided_slice %300 {offsets = [0, 96], sizes = [2, 32], strides = [1, 1]} : vector<2x128xf32> to vector<2x32xf32>
    %305 = arith.mulf %302, %266 : vector<2x32xf32>
    %306 = arith.mulf %301, %303 : vector<2x32xf32>
    %307 = arith.addf %305, %306 : vector<2x32xf32>
    %308 = math.tanh %307 : vector<2x32xf32>
    %309 = arith.mulf %304, %308 : vector<2x32xf32>
    %310 = tpu.concatenate %268, %289 in 1 : vector<2x32xf32>, vector<2x32xf32> -> vector<2x64xf32>
    %311 = arith.truncf %310 : vector<2x64xf32> to vector<2x64xbf16>
    %cst_34 = arith.constant dense<0.000000e+00> : vector<2x128xf32>
    %312 = tpu.matmul %311, %3, %cst_34 {dimension_numbers = #tpu.dot_dimension_numbers<[1], [0], [0], [1], [0, 0, 1, 1], [], []>} : vector<2x64xbf16>, vector<64x128xbf16>, vector<2x128xf32> -> vector<2x128xf32>
    %313 = vector.broadcast %4 : vector<1x128xf32> to vector<2x128xf32>
    %314 = arith.addf %312, %313 : vector<2x128xf32>
    %315 = vector.broadcast %19 : vector<1x128xf32> to vector<2x128xf32>
    %316 = arith.mulf %314, %315 : vector<2x128xf32>
    %317 = math.tanh %316 : vector<2x128xf32>
    %318 = vector.broadcast %19 : vector<1x128xf32> to vector<2x128xf32>
    %319 = arith.mulf %317, %318 : vector<2x128xf32>
    %320 = vector.broadcast %22 : vector<1x128xf32> to vector<2x128xf32>
    %321 = arith.addf %319, %320 : vector<2x128xf32>
    %322 = vector.extract_strided_slice %321 {offsets = [0, 0], sizes = [2, 32], strides = [1, 1]} : vector<2x128xf32> to vector<2x32xf32>
    %323 = vector.extract_strided_slice %321 {offsets = [0, 32], sizes = [2, 32], strides = [1, 1]} : vector<2x128xf32> to vector<2x32xf32>
    %324 = vector.extract_strided_slice %321 {offsets = [0, 64], sizes = [2, 32], strides = [1, 1]} : vector<2x128xf32> to vector<2x32xf32>
    %325 = vector.extract_strided_slice %321 {offsets = [0, 96], sizes = [2, 32], strides = [1, 1]} : vector<2x128xf32> to vector<2x32xf32>
    %326 = arith.mulf %323, %287 : vector<2x32xf32>
    %327 = arith.mulf %322, %324 : vector<2x32xf32>
    %328 = arith.addf %326, %327 : vector<2x32xf32>
    %329 = math.tanh %328 : vector<2x32xf32>
    %330 = arith.mulf %325, %329 : vector<2x32xf32>
    %331 = tpu.concatenate %309, %330 in 1 : vector<2x32xf32>, vector<2x32xf32> -> vector<2x64xf32>
    %332 = arith.truncf %331 : vector<2x64xf32> to vector<2x64xbf16>
    %cst_35 = arith.constant dense<0.000000e+00> : vector<2x128xf32>
    %333 = tpu.matmul %332, %3, %cst_35 {dimension_numbers = #tpu.dot_dimension_numbers<[1], [0], [0], [1], [0, 0, 1, 1], [], []>} : vector<2x64xbf16>, vector<64x128xbf16>, vector<2x128xf32> -> vector<2x128xf32>
    %334 = vector.broadcast %4 : vector<1x128xf32> to vector<2x128xf32>
    %335 = arith.addf %333, %334 : vector<2x128xf32>
    %336 = vector.broadcast %19 : vector<1x128xf32> to vector<2x128xf32>
    %337 = arith.mulf %335, %336 : vector<2x128xf32>
    %338 = math.tanh %337 : vector<2x128xf32>
    %339 = vector.broadcast %19 : vector<1x128xf32> to vector<2x128xf32>
    %340 = arith.mulf %338, %339 : vector<2x128xf32>
    %341 = vector.broadcast %22 : vector<1x128xf32> to vector<2x128xf32>
    %342 = arith.addf %340, %341 : vector<2x128xf32>
    %343 = vector.extract_strided_slice %342 {offsets = [0, 0], sizes = [2, 32], strides = [1, 1]} : vector<2x128xf32> to vector<2x32xf32>
    %344 = vector.extract_strided_slice %342 {offsets = [0, 32], sizes = [2, 32], strides = [1, 1]} : vector<2x128xf32> to vector<2x32xf32>
    %345 = vector.extract_strided_slice %342 {offsets = [0, 64], sizes = [2, 32], strides = [1, 1]} : vector<2x128xf32> to vector<2x32xf32>
    %346 = vector.extract_strided_slice %342 {offsets = [0, 96], sizes = [2, 32], strides = [1, 1]} : vector<2x128xf32> to vector<2x32xf32>
    %347 = arith.mulf %344, %328 : vector<2x32xf32>
    %348 = arith.mulf %343, %345 : vector<2x32xf32>
    %349 = arith.addf %347, %348 : vector<2x32xf32>
    %350 = math.tanh %349 : vector<2x32xf32>
    %351 = arith.mulf %346, %350 : vector<2x32xf32>
    %cst_36 = arith.constant 0.000000e+00 : f32
    %352 = vector.broadcast %cst_36 : f32 to vector<2x32xf32>
    %353 = arith.maximumf %351, %352 : vector<2x32xf32>
    %354 = arith.truncf %353 : vector<2x32xf32> to vector<2x32xbf16>
    %cst_37 = arith.constant dense<0.000000e+00> : vector<2x4xf32>
    %355 = tpu.matmul %354, %5, %cst_37 {dimension_numbers = #tpu.dot_dimension_numbers<[1], [0], [0], [1], [0, 0, 1, 1], [], []>} : vector<2x32xbf16>, vector<32x4xbf16>, vector<2x4xf32> -> vector<2x4xf32>
    %356 = vector.broadcast %6 : vector<1x4xf32> to vector<2x4xf32>
    %357 = arith.addf %355, %356 : vector<2x4xf32>
    %c0_38 = arith.constant 0 : index
    %c0_39 = arith.constant 0 : index
    %358 = vector.load %arg8[%c0_38, %c0_39] : memref<2x4xf32, #tpu.memory_space<vmem>>, vector<2x4xf32>
    tpu.vector_store %arg8[%c0_38, %c0_39], %357 {strides = array<i32>} : memref<2x4xf32, #tpu.memory_space<vmem>>, vector<2x4xf32>,
    return
  }
}

</mosaic_0001>

<bundles_post_ra>
// kernel: lstm1_forward.1
= control target key start
LH: loop header
LB: loop body
LE: loop exit
PB: predicated region body
PF: predicated region fallthrough
CT: control target
= control target key end

     0   :  { %v1825_v1 = vmov 0.0   ;;  %vm1826_vm0 = vmmov 0   ;;  %vm71_vm1 = vcmask 130048   ;;  %s2296_s0 = inlined_call_operand.vmem [shape: bf16[16,16], index: 0, kind: input, shape index: {}]   ;;  %s2297_s1 = inlined_call_operand.vmem [shape: bf16[16,128], index: 1, kind: input, shape index: {}]   ;;  %s2298_s2 = inlined_call_operand.vmem [shape: bf16[32,128], index: 2, kind: input, shape index: {}]   ;;  %s2299_s3 = inlined_call_operand.vmem [shape: f32[1,128], index: 3, kind: input, shape index: {}]   ;;  %s2300_s4 = inlined_call_operand.vmem [shape: bf16[64,128], index: 4, kind: input, shape index: {}]   ;;  %s2301_s5 = inlined_call_operand.vmem [shape: f32[1,128], index: 5, kind: input, shape index: {}]   ;;  %s2302_s6 = inlined_call_operand.vmem [shape: bf16[32,4], index: 6, kind: input, shape index: {}]   ;;  %s2303_s7 = inlined_call_operand.vmem [shape: f32[1,4], index: 7, kind: input, shape index: {}]   ;;  %s2304_s8 = inlined_call_operand.hbm [shape: f32[2,4], index: 8, kind: output, shape index: {}]  }
   0x1   :  { %v1727_v0 = vld [vmem:[%s2297_s1] sm:$0xff]   ;;  %1546 = vmatprep.subr.bf16.mxu0 %v1825_v1  ;;  %1552 = vmatprep.subr.bf16.mxu1 %v1825_v1  ;;  %v1896_v4 = vld [vmem:[%s2298_s2 + $0x8] sm:$0xff]  }
   0x2   :  { %v1885_v2 = vld [vmem:[%s2298_s2] sm:$0xff]   ;;  %1547 = vmatpush3.bf16.msra.mxu0 %v1727_v0  ;;  %1548 = vmatprep.mubr.msk.bf16.mxu0 %vm1826_vm0, %v1825_v1 }
   0x3   :  { %v1729_v3 = vld [vmem:[%s2296_s0] sm:$0xff]   ;;  %1553 = vmatpush3.bf16.msra.mxu1 %v1885_v2  ;;  %1556 = vmatprep.mubr.msk.bf16.mxu1 %vm1826_vm0, %v1825_v1 }
   0x4   :  { %1554 = vmatprep.subr.bf16.mxu1 %v1825_v1  ;;  %1560 = vmatprep.subr.bf16.mxu0 %v1825_v1 }
   0x5   :  { %1549 = vmatmul.mubr.msk.bf16.vlgmr.msra.gmra.mrb[0].mxu0 %vm71_vm1, %v1729_v3 }
   0x6   :  { %1561 = vmatpush3.bf16.msra.mxu0 %v1885_v2  ;;  %1564 = vmatprep.mubr.msk.bf16.mxu0 %vm1826_vm0, %v1825_v1 }
   0x7   :  { %1555 = vmatpush3.bf16.msra.mxu1 %v1896_v4  ;;  %1562 = vmatprep.subr.bf16.mxu0 %v1825_v1 }
   0x8   :  { %1568 = vmatprep.subr.bf16.mxu1 %v1825_v1 }
   0x9   :  { %13 = vsyncpa [#allocation3], 0  ;;  %v1827_v5 = vmov 0   ;;  %v116_v6 = vlaneseq  ;;  %v1447_v8 = vld [vmem:[%s2299_s3] ss:$0 sm:$0xff]  ;;  %v1828_v15 = vmov 0.5  }
   0xa   :  { %1557 = vmatmul.mubr.bf16.vlgmr.msra.gmra.mrb[0].mxu1 %v1827_v5  ;;  %1563 = vmatpush3.bf16.msra.mxu0 %v1896_v4  ;;  %s1829_s3 = smov 64   ;;  %s1830_s12 = smov 32   ;;  %v1935_v32 = vld [vmem:[%s2300_s4] sm:$0xff]   ;;  %v1941_v33 = vld [vmem:[%s2300_s4 + $0x8] sm:$0xff]   ;;  %v1948_v34 = vld [vmem:[%s2300_s4 + $0x10] sm:$0xff]   ;;  %vm135_vm5 = vcmask 261120  }
   0xb   :  { %1576 = vmatprep.mubr.msk.bf16.mxu1 %vm1826_vm0, %v1825_v1  ;;  %1580 = vmatprep.subr.bf16.mxu0 %v1825_v1  ;;  %v117_v7 = vand.u32 127, %v116_v6  ;;  %v1957_v36 = vld [vmem:[%s2300_s4 + $0x18] sm:$0xff]   ;;  %vm312_vm6 = vcmask 523264   ;;  %v1981_v44 = vld [vmem:[%s2301_s5] ss:$0 sm:$0xff]  ;;  %vm1431_vm7 = vcmask 25600  }
   0xc   :  { %1569 = vmatpush3.bf16.msra.mxu1 %v1935_v32 }
   0xd   :  { %vm118_vm2 = vcmp.ge.s32.totalorder %v117_v7, 64  ;;  %vm119_vm3 = vcmp.lt.s32.totalorder %v117_v7, 96  ;;  %1570 = vmatprep.subr.bf16.mxu1 %v1825_v1 }
   0xe   :  { %vm120_vm4 = vmand %vm118_vm2, %vm119_vm3 }
   0xf   :  { %v1919_v16 = vsel %vm120_vm4, 1.0, %v1828_v15  ;;  %v1923_v24 = vsel %vm120_vm4, 0.0, %v1828_v15 }
  0x10   :  { %1571 = vmatpush3.bf16.msra.mxu1 %v1941_v33 }
  0x11   :  { %1572 = vmatprep.subr.bf16.mxu1 %v1825_v1 }
  0x14   :  { %1573 = vmatpush3.bf16.msra.mxu1 %v1948_v34 }
  0x15   :  { %1574 = vmatprep.subr.bf16.mxu1 %v1825_v1 }
  0x18   :  { %1575 = vmatpush3.bf16.msra.mxu1 %v1957_v36 }
  0x19   :  { %1600 = vmatprep.subr.bf16.mxu1 %v1825_v1 }
  0xd8   :  { %v109_v9 = vpop.f32.mrb[0].mxu0 }
  0xd9   :  { %v1550_v10 = vpop.f32.mrb[1].mxu0  ;;  %v1915_v11 = vadd.f32 %v1447_v8, %v109_v9 }
  0xda   :  { %v112_v12 = vpop.f32.mrb[2].mxu0 }
  0xdb   :  { %v1917_v13 = vadd.f32 %v1447_v8, %v112_v12  ;;  %v1551_v14 = vpop.f32.mrb[3].mxu0 }
  0xdd   :  { %v173_v17 = vpop.f32.mrb[0].mxu1 }
  0xde   :  { %v179_v18 = vadd.f32 %v173_v17, %v1915_v11  ;;  %v1558_v19 = vpop.f32.mrb[1].mxu1 }
  0xdf   :  { %v176_v20 = vpop.f32.mrb[2].mxu1 }
  0xe0   :  { %v180_v21 = vmul.f32 %v179_v18, %v1919_v16  ;;  %v1559_v22 = vpop.f32.mrb[3].mxu1 }
  0xe2   :  { %1737 = vtanh.f32 %v180_v21 }
  0xec   :  { %v1738_v23 = vpop.eup %1737 }
  0xed   :  { %v182_v25 = vmul.f32 %v1738_v23, %v1919_v16 }
  0xef   :  { %v183_v26 = vadd.f32 %v182_v25, %v1923_v24 }
  0xf1   :  { %186 = vrot.lane.b32.xlu0 %v183_v26, %s1829_s3  ;;  %v184_v29 = vmul.f32 0.0, %v183_v26 }
 0x163   :  { %v187_v27 = vpop.permute.xlu0 %186 }
 0x164   :  { %v189_v28 = vmul.f32 %v187_v27, %v183_v26 }
 0x166   :  { %191 = vrot.lane.b32.xlu0 %v189_v28, %s1830_s12 }
 0x1d8   :  { %v192_v30 = vpop.permute.xlu0 %191 }
 0x1d9   :  { %v1929_v31 = vadd.f32 %v192_v30, %v184_v29 }
 0x1db   :  { %1739 = vtanh.f32 %v1929_v31  ;;  %v257_v7 = vrot.slane %v1929_v31, 6 }
 0x1e5   :  { %v1740_v35 = vpop.eup %1739 }
 0x1e6   :  { %197 = vrot.lane.b32.xlu1 %v1740_v35, %s1829_s3 }
 0x258   :  { %v198_v37 = vpop.permute.xlu1 %197 }
 0x259   :  { %v200_v38 = vmul.f32 %v198_v37, %v183_v26 }
 0x25b   :  { %v201_v39 = vpack.c.bf16 %v200_v38, %v200_v38  ;;  %277 = vrot.lane.b32.xlu0 %v200_v38, %s1830_s12 }
 0x25d   :  { %203 = vrot.lane.b32.xlu1 %v201_v39, %s1830_s12 }
 0x2cd   :  { %v278_v40 = vpop.permute.xlu0 %277 }
 0x2ce   :  { %v280_v41 = vsel %vm135_vm5, %v278_v40, 0.0 }
 0x2cf   :  { %v281_v42 = vpack.c.bf16 %v280_v41, %v280_v41  ;;  %v204_v43 = vpop.permute.xlu1 %203 }
 0x2d0   :  { %1565 = vmatmul.mubr.msk.bf16.vlgmr.msra.gmra.mrb[4].mxu0 %vm135_vm5, %v204_v43 }
 0x2d1   :  { %1577 = vmatmul.mubr.msk.bf16.vlgmr.msra.gmra.mrb[4].mxu1 %vm312_vm6, %v281_v42  ;;  %1581 = vmatpush3.bf16.msra.mxu0 %v1885_v2 }
 0x2d2   :  { %1582 = vmatprep.subr.bf16.mxu0 %v1825_v1  ;;  %1584 = vmatprep.mubr.msk.bf16.mxu0 %vm1826_vm0, %v1825_v1 }
 0x2d3   :  { %1601 = vmatpush3.bf16.msra.mxu1 %v1885_v2  ;;  %1604 = vmatprep.mubr.msk.bf16.mxu1 %vm1826_vm0, %v1825_v1 }
 0x2d4   :  { %1602 = vmatprep.subr.bf16.mxu1 %v1825_v1 }
 0x2d5   :  { %1583 = vmatpush3.bf16.msra.mxu0 %v1896_v4 }
 0x2d6   :  { %1588 = vmatprep.subr.bf16.mxu0 %v1825_v1 }
 0x2d7   :  { %1603 = vmatpush3.bf16.msra.mxu1 %v1896_v4 }
 0x2d8   :  { %1608 = vmatprep.subr.bf16.mxu1 %v1825_v1 }
 0x3a3   :  { %v242_v45 = vpop.f32.mrb[4].mxu0 }
 0x3a4   :  { %v249_v46 = vrot.slane %v242_v45, 6  ;;  %v1566_v47 = vpop.f32.mrb[5].mxu0  ;;  %v350_v48 = vpop.f32.mrb[4].mxu1 }
 0x3a5   :  { %v351_v49 = vadd.f32 %v1981_v44, %v350_v48  ;;  %v245_v50 = vpop.f32.mrb[6].mxu0  ;;  %v1578_v51 = vpop.f32.mrb[5].mxu1 }
 0x3a6   :  { %v251_v52 = vadd.f32 %v249_v46, %v1915_v11  ;;  %v1567_v53 = vpop.f32.mrb[7].mxu0  ;;  %v353_v54 = vpop.f32.mrb[6].mxu1 }
 0x3a7   :  { %v356_v55 = vmul.f32 %v351_v49, %v1919_v16  ;;  %v1579_v56 = vpop.f32.mrb[7].mxu1 }
 0x3a8   :  { %v252_v57 = vmul.f32 %v251_v52, %v1919_v16 }
 0x3a9   :  { %1741 = vtanh.f32 %v356_v55 }
 0x3aa   :  { %1743 = vtanh.f32 %v252_v57 }
 0x3b3   :  { %v1742_v58 = vpop.eup %1741 }
 0x3b4   :  { %v1744_v59 = vpop.eup %1743  ;;  %v358_v60 = vmul.f32 %v1742_v58, %v1919_v16 }
 0x3b5   :  { %v254_v61 = vmul.f32 %v1744_v59, %v1919_v16 }
 0x3b6   :  { %v359_v62 = vadd.f32 %v358_v60, %v1923_v24 }
 0x3b7   :  { %v255_v63 = vadd.f32 %v254_v61, %v1923_v24 }
 0x3b8   :  { %362 = vrot.lane.b32.xlu0 %v359_v62, %s1829_s3  ;;  %v360_v8 = vmul.f32 0.0, %v359_v62 }
 0x3b9   :  { %261 = vrot.lane.b32.xlu1 %v255_v63, %s1829_s3  ;;  %v259_v10 = vmul.f32 %v257_v7, %v255_v63 }
 0x42a   :  { %v363_v0 = vpop.permute.xlu0 %362 }
 0x42b   :  { %v365_v3 = vmul.f32 %v363_v0, %v359_v62  ;;  %v262_v5 = vpop.permute.xlu1 %261 }
 0x42c   :  { %v264_v6 = vmul.f32 %v262_v5, %v255_v63 }
 0x42d   :  { %367 = vrot.lane.b32.xlu0 %v365_v3, %s1830_s12 }
 0x42e   :  { %266 = vrot.lane.b32.xlu1 %v264_v6, %s1830_s12 }
 0x49f   :  { %v368_v9 = vpop.permute.xlu0 %367 }
 0x4a0   :  { %v1996_v12 = vadd.f32 %v368_v9, %v360_v8  ;;  %v267_v14 = vpop.permute.xlu1 %266 }
 0x4a1   :  { %v1998_v15 = vadd.f32 %v267_v14, %v259_v10 }
 0x4a2   :  { %1745 = vtanh.f32 %v1996_v12 }
 0x4a3   :  { %1747 = vtanh.f32 %v1998_v15  ;;  %v434_v61 = vrot.slane %v1998_v15, 6 }
 0x4ac   :  { %v1746_v17 = vpop.eup %1745 }
 0x4ad   :  { %v1748_v18 = vpop.eup %1747  ;;  %373 = vrot.lane.b32.xlu0 %v1746_v17, %s1829_s3 }
 0x4ae   :  { %272 = vrot.lane.b32.xlu1 %v1748_v18, %s1829_s3 }
 0x51f   :  { %v374_v21 = vpop.permute.xlu0 %373 }
 0x520   :  { %v273_v19 = vpop.permute.xlu1 %272  ;;  %v376_v23 = vmul.f32 %v374_v21, %v359_v62 }
 0x521   :  { %v275_v20 = vmul.f32 %v273_v19, %v255_v63 }
 0x522   :  { %v458_v26 = vrot.slane %v376_v23, 6 }
 0x523   :  { %v377_v22 = vpack.c.bf16 %v275_v20, %v275_v20  ;;  %454 = vrot.lane.b32.xlu0 %v275_v20, %s1830_s12 }
 0x525   :  { %v379_v25 = vrot.slane %v377_v22, 1 }
 0x527   :  { %380 = vrot.lane.b32.xlu1 %v379_v25, %s1830_s12 }
 0x52b   :  { %459 = vrot.lane.b32.xlu1 %v458_v26, %s1829_s3 }
 0x595   :  { %v455_v29 = vpop.permute.xlu0 %454 }
 0x599   :  { %v381_v27 = vpop.permute.xlu1 %380 }
 0x59a   :  { %1585 = vmatmul.mubr.msk.bf16.vlgmr.msra.gmra.mrb[8].mxu0 %vm135_vm5, %v381_v27 }
 0x59b   :  { %1589 = vmatpush3.bf16.msra.mxu0 %v1935_v32  ;;  %1596 = vmatprep.mubr.msk.bf16.mxu0 %vm1826_vm0, %v1825_v1 }
 0x59c   :  { %1590 = vmatprep.subr.bf16.mxu0 %v1825_v1 }
 0x59d   :  { %v460_v28 = vpop.permute.xlu1 %459 }
 0x59e   :  { %v462_v30 = vsel %vm135_vm5, %v455_v29, %v460_v28 }
 0x59f   :  { %1591 = vmatpush3.bf16.msra.mxu0 %v1941_v33  ;;  %v463_v31 = vpack.c.bf16 %v462_v30, %v462_v30 }
 0x5a0   :  { %1592 = vmatprep.subr.bf16.mxu0 %v1825_v1 }
 0x5a1   :  { %v465_v35 = vrot.slane %v463_v31, 1 }
 0x5a3   :  { %1593 = vmatpush3.bf16.msra.mxu0 %v1948_v34 }
 0x5a4   :  { %1594 = vmatprep.subr.bf16.mxu0 %v1825_v1 }
 0x5a7   :  { %1595 = vmatpush3.bf16.msra.mxu0 %v1957_v36 }
 0x5a8   :  { %1620 = vmatprep.subr.bf16.mxu0 %v1825_v1 }
 0x5aa   :  { %1597 = vmatmul.mubr.msk.bf16.vlgmr.msra.gmra.mrb[12].mxu0 %vm312_vm6, %v465_v35 }
 0x5ab   :  { %1621 = vmatpush3.bf16.msra.mxu0 %v1885_v2  ;;  %1624 = vmatprep.mubr.msk.bf16.mxu0 %vm1826_vm0, %v1825_v1 }
 0x5ac   :  { %1622 = vmatprep.subr.bf16.mxu0 %v1825_v1 }
 0x5af   :  { %1623 = vmatpush3.bf16.msra.mxu0 %v1896_v4 }
 0x5b0   :  { %1628 = vmatprep.subr.bf16.mxu0 %v1825_v1 }
 0x66d   :  { %v419_v37 = vpop.f32.mrb[8].mxu0 }
 0x66e   :  { %v426_v38 = vrot.slane %v419_v37, 4  ;;  %v1586_v39 = vpop.f32.mrb[9].mxu0 }
 0x66f   :  { %v422_v40 = vpop.f32.mrb[10].mxu0 }
 0x670   :  { %v428_v41 = vadd.f32 %v426_v38, %v1915_v11  ;;  %v1587_v42 = vpop.f32.mrb[11].mxu0 }
 0x672   :  { %v429_v43 = vmul.f32 %v428_v41, %v1919_v16 }
 0x674   :  { %1749 = vtanh.f32 %v429_v43 }
 0x67d   :  { %v503_v45 = vpop.f32.mrb[12].mxu0 }
 0x67e   :  { %v1750_v46 = vpop.eup %1749  ;;  %v504_v47 = vadd.f32 %v1981_v44, %v503_v45  ;;  %v1598_v48 = vpop.f32.mrb[13].mxu0 }
 0x67f   :  { %v506_v49 = vpop.f32.mrb[14].mxu0  ;;  %v431_v50 = vmul.f32 %v1750_v46, %v1919_v16 }
 0x680   :  { %v509_v51 = vmul.f32 %v504_v47, %v1919_v16  ;;  %v1599_v52 = vpop.f32.mrb[15].mxu0 }
 0x681   :  { %v432_v53 = vadd.f32 %v431_v50, %v1923_v24 }
 0x682   :  { %1751 = vtanh.f32 %v509_v51 }
 0x683   :  { %438 = vrot.lane.b32.xlu0 %v432_v53, %s1829_s3  ;;  %v436_v62 = vmul.f32 %v434_v61, %v432_v53 }
 0x68c   :  { %v1752_v54 = vpop.eup %1751 }
 0x68d   :  { %v511_v55 = vmul.f32 %v1752_v54, %v1919_v16 }
 0x68f   :  { %v512_v56 = vadd.f32 %v511_v55, %v1923_v24 }
 0x691   :  { %515 = vrot.lane.b32.xlu1 %v512_v56, %s1829_s3  ;;  %v513_v5 = vmul.f32 %v512_v56, %v1996_v12 }
 0x6f5   :  { %v439_v57 = vpop.permute.xlu0 %438 }
 0x6f6   :  { %v441_v58 = vmul.f32 %v439_v57, %v432_v53 }
 0x6f8   :  { %443 = vrot.lane.b32.xlu0 %v441_v58, %s1830_s12 }
 0x703   :  { %v516_v59 = vpop.permute.xlu1 %515 }
 0x704   :  { %v518_v60 = vmul.f32 %v516_v59, %v512_v56 }
 0x706   :  { %520 = vrot.lane.b32.xlu1 %v518_v60, %s1830_s12 }
 0x76a   :  { %v444_v63 = vpop.permute.xlu0 %443 }
 0x76b   :  { %v2039_v0 = vadd.f32 %v444_v63, %v436_v62 }
 0x76d   :  { %1753 = vtanh.f32 %v2039_v0 }
 0x777   :  { %v1754_v3 = vpop.eup %1753 }
 0x778   :  { %v521_v6 = vpop.permute.xlu1 %520  ;;  %449 = vrot.lane.b32.xlu0 %v1754_v3, %s1829_s3 }
 0x779   :  { %v2044_v7 = vadd.f32 %v521_v6, %v513_v5 }
 0x77b   :  { %1755 = vtanh.f32 %v2044_v7 }
 0x785   :  { %v1756_v8 = vpop.eup %1755 }
 0x786   :  { %526 = vrot.lane.b32.xlu1 %v1756_v8, %s1829_s3 }
 0x7ea   :  { %v450_v9 = vpop.permute.xlu0 %449 }
 0x7eb   :  { %v452_v10 = vmul.f32 %v450_v9, %v432_v53  ;;  %v587_v53 = vrot.slane %v2039_v0, 6 }
 0x7ed   :  { %v530_v14 = vpack.c.bf16 %v452_v10, %v452_v10  ;;  %607 = vrot.lane.b32.xlu1 %v452_v10, %s1830_s12 }
 0x7ef   :  { %v532_v15 = vrot.slane %v530_v14, 2 }
 0x7f1   :  { %533 = vrot.lane.b32.xlu0 %v532_v15, %s1830_s12 }
 0x7f8   :  { %v527_v17 = vpop.permute.xlu1 %526 }
 0x7f9   :  { %v529_v12 = vmul.f32 %v527_v17, %v512_v56 }
 0x7fb   :  { %v611_v18 = vrot.slane %v529_v12, 4 }
 0x7fd   :  { %612 = vrot.lane.b32.xlu0 %v611_v18, %s1829_s3 }
 0x85f   :  { %v608_v20 = vpop.permute.xlu1 %607 }
 0x863   :  { %v534_v19 = vpop.permute.xlu0 %533 }
 0x864   :  { %1605 = vmatmul.mubr.msk.bf16.vlgmr.msra.gmra.mrb[8].mxu1 %vm135_vm5, %v534_v19 }
 0x865   :  { %1609 = vmatpush3.bf16.msra.mxu1 %v1935_v32  ;;  %1616 = vmatprep.mubr.msk.bf16.mxu1 %vm1826_vm0, %v1825_v1 }
 0x866   :  { %1610 = vmatprep.subr.bf16.mxu1 %v1825_v1 }
 0x869   :  { %1611 = vmatpush3.bf16.msra.mxu1 %v1941_v33 }
 0x86a   :  { %1612 = vmatprep.subr.bf16.mxu1 %v1825_v1 }
 0x86d   :  { %1613 = vmatpush3.bf16.msra.mxu1 %v1948_v34 }
 0x86e   :  { %1614 = vmatprep.subr.bf16.mxu1 %v1825_v1 }
 0x86f   :  { %v613_v21 = vpop.permute.xlu0 %612 }
 0x870   :  { %v615_v22 = vsel %vm135_vm5, %v608_v20, %v613_v21 }
 0x871   :  { %v616_v23 = vpack.c.bf16 %v615_v22, %v615_v22  ;;  %1615 = vmatpush3.bf16.msra.mxu1 %v1957_v36 }
 0x872   :  { %1640 = vmatprep.subr.bf16.mxu1 %v1825_v1 }
 0x873   :  { %v618_v25 = vrot.slane %v616_v23, 2 }
 0x875   :  { %1617 = vmatmul.mubr.msk.bf16.vlgmr.msra.gmra.mrb[12].mxu1 %vm312_vm6, %v618_v25 }
 0x876   :  { %1641 = vmatpush3.bf16.msra.mxu1 %v1885_v2  ;;  %1644 = vmatprep.mubr.msk.bf16.mxu1 %vm1826_vm0, %v1825_v1 }
 0x877   :  { %1642 = vmatprep.subr.bf16.mxu1 %v1825_v1 }
 0x87a   :  { %1643 = vmatpush3.bf16.msra.mxu1 %v1896_v4 }
 0x87b   :  { %1648 = vmatprep.subr.bf16.mxu1 %v1825_v1 }
 0x937   :  { %v572_v26 = vpop.f32.mrb[8].mxu1 }
 0x938   :  { %v579_v27 = vrot.slane %v572_v26, 2  ;;  %v1606_v28 = vpop.f32.mrb[9].mxu1 }
 0x939   :  { %v575_v29 = vpop.f32.mrb[10].mxu1 }
 0x93a   :  { %v581_v30 = vadd.f32 %v579_v27, %v1915_v11  ;;  %v1607_v31 = vpop.f32.mrb[11].mxu1 }
 0x93c   :  { %v582_v35 = vmul.f32 %v581_v30, %v1919_v16 }
 0x93e   :  { %1757 = vtanh.f32 %v582_v35 }
 0x948   :  { %v1758_v37 = vpop.eup %1757  ;;  %v656_v38 = vpop.f32.mrb[12].mxu1 }
 0x949   :  { %v657_v39 = vadd.f32 %v1981_v44, %v656_v38  ;;  %v1618_v40 = vpop.f32.mrb[13].mxu1  ;;  %v584_v41 = vmul.f32 %v1758_v37, %v1919_v16 }
 0x94a   :  { %v659_v42 = vpop.f32.mrb[14].mxu1 }
 0x94b   :  { %v662_v43 = vmul.f32 %v657_v39, %v1919_v16  ;;  %v1619_v45 = vpop.f32.mrb[15].mxu1  ;;  %v585_v46 = vadd.f32 %v584_v41, %v1923_v24 }
 0x94d   :  { %1759 = vtanh.f32 %v662_v43  ;;  %591 = vrot.lane.b32.xlu1 %v585_v46, %s1829_s3  ;;  %v589_v54 = vmul.f32 %v587_v53, %v585_v46 }
 0x957   :  { %v1760_v11 = vpop.eup %1759 }
 0x958   :  { %v664_v47 = vmul.f32 %v1760_v11, %v1919_v16 }
 0x95a   :  { %v665_v48 = vadd.f32 %v664_v47, %v1923_v24 }
 0x95c   :  { %668 = vrot.lane.b32.xlu0 %v665_v48, %s1829_s3  ;;  %v666_v58 = vmul.f32 %v665_v48, %v2044_v7 }
 0x9bf   :  { %v592_v49 = vpop.permute.xlu1 %591 }
 0x9c0   :  { %v594_v50 = vmul.f32 %v592_v49, %v585_v46 }
 0x9c2   :  { %596 = vrot.lane.b32.xlu1 %v594_v50, %s1830_s12 }
 0x9ce   :  { %v669_v51 = vpop.permute.xlu0 %668 }
 0x9cf   :  { %v671_v52 = vmul.f32 %v669_v51, %v665_v48 }
 0x9d1   :  { %673 = vrot.lane.b32.xlu0 %v671_v52, %s1830_s12 }
 0xa34   :  { %v597_v55 = vpop.permute.xlu1 %596 }
 0xa35   :  { %v2083_v56 = vadd.f32 %v597_v55, %v589_v54 }
 0xa37   :  { %1761 = vtanh.f32 %v2083_v56  ;;  %v737_v45 = vrot.slane %v2083_v56, 6 }
 0xa41   :  { %v1762_v57 = vpop.eup %1761 }
 0xa42   :  { %602 = vrot.lane.b32.xlu1 %v1762_v57, %s1829_s3 }
 0xa43   :  { %v674_v59 = vpop.permute.xlu0 %673 }
 0xa44   :  { %v2088_v60 = vadd.f32 %v674_v59, %v666_v58 }
 0xa46   :  { %1763 = vtanh.f32 %v2088_v60 }
 0xa50   :  { %v1764_v61 = vpop.eup %1763 }
 0xa51   :  { %679 = vrot.lane.b32.xlu0 %v1764_v61, %s1829_s3 }
 0xab4   :  { %v603_v62 = vpop.permute.xlu1 %602 }
 0xab5   :  { %v605_v63 = vmul.f32 %v603_v62, %v585_v46 }
 0xab7   :  { %v683_v0 = vpack.c.bf16 %v605_v63, %v605_v63  ;;  %757 = vrot.lane.b32.xlu0 %v605_v63, %s1830_s12 }
 0xab9   :  { %v685_v3 = vrot.slane %v683_v0, 3 }
 0xabb   :  { %686 = vrot.lane.b32.xlu1 %v685_v3, %s1830_s12 }
 0xac3   :  { %v680_v5 = vpop.permute.xlu0 %679 }
 0xac4   :  { %v682_v6 = vmul.f32 %v680_v5, %v665_v48 }
 0xac6   :  { %v761_v7 = vrot.slane %v682_v6, 2 }
 0xac8   :  { %762 = vrot.lane.b32.xlu1 %v761_v7, %s1829_s3 }
 0xb29   :  { %v758_v9 = vpop.permute.xlu0 %757 }
 0xb2d   :  { %v687_v8 = vpop.permute.xlu1 %686 }
 0xb2e   :  { %1625 = vmatmul.mubr.msk.bf16.vlgmr.msra.gmra.mrb[16].mxu0 %vm135_vm5, %v687_v8 }
 0xb2f   :  { %1629 = vmatpush3.bf16.msra.mxu0 %v1935_v32  ;;  %1636 = vmatprep.mubr.msk.bf16.mxu0 %vm1826_vm0, %v1825_v1 }
 0xb30   :  { %1630 = vmatprep.subr.bf16.mxu0 %v1825_v1 }
 0xb33   :  { %1631 = vmatpush3.bf16.msra.mxu0 %v1941_v33 }
 0xb34   :  { %1632 = vmatprep.subr.bf16.mxu0 %v1825_v1 }
 0xb37   :  { %1633 = vmatpush3.bf16.msra.mxu0 %v1948_v34 }
 0xb38   :  { %1634 = vmatprep.subr.bf16.mxu0 %v1825_v1 }
 0xb3a   :  { %v763_v10 = vpop.permute.xlu1 %762 }
 0xb3b   :  { %v765_v14 = vsel %vm135_vm5, %v758_v9, %v763_v10  ;;  %1635 = vmatpush3.bf16.msra.mxu0 %v1957_v36 }
 0xb3c   :  { %v766_v15 = vpack.c.bf16 %v765_v14, %v765_v14  ;;  %1660 = vmatprep.subr.bf16.mxu0 %v1825_v1 }
 0xb3e   :  { %v768_v17 = vrot.slane %v766_v15, 3 }
 0xb40   :  { %1637 = vmatmul.mubr.msk.bf16.vlgmr.msra.gmra.mrb[20].mxu0 %vm312_vm6, %v768_v17 }
 0xb41   :  { %1661 = vmatpush3.bf16.msra.mxu0 %v1885_v2  ;;  %1664 = vmatprep.mubr.msk.bf16.mxu0 %vm1826_vm0, %v1825_v1 }
 0xb42   :  { %1662 = vmatprep.subr.bf16.mxu0 %v1825_v1 }
 0xb45   :  { %1663 = vmatpush3.bf16.msra.mxu0 %v1896_v4 }
 0xb46   :  { %1668 = vmatprep.subr.bf16.mxu0 %v1825_v1 }
 0xc01   :  { %v725_v12 = vpop.f32.mrb[16].mxu0 }
 0xc02   :  { %v731_v18 = vadd.f32 %v725_v12, %v1917_v13  ;;  %v1626_v19 = vpop.f32.mrb[17].mxu0 }
 0xc03   :  { %v728_v20 = vpop.f32.mrb[18].mxu0 }
 0xc04   :  { %v732_v21 = vmul.f32 %v731_v18, %v1919_v16  ;;  %v1627_v22 = vpop.f32.mrb[19].mxu0 }
 0xc06   :  { %1765 = vtanh.f32 %v732_v21 }
 0xc10   :  { %v1766_v23 = vpop.eup %1765 }
 0xc11   :  { %v734_v25 = vmul.f32 %v1766_v23, %v1919_v16 }
 0xc13   :  { %v806_v26 = vpop.f32.mrb[20].mxu0  ;;  %v735_v27 = vadd.f32 %v734_v25, %v1923_v24 }
 0xc14   :  { %v807_v28 = vadd.f32 %v1981_v44, %v806_v26  ;;  %v1638_v29 = vpop.f32.mrb[21].mxu0 }
 0xc15   :  { %v809_v30 = vpop.f32.mrb[22].mxu0  ;;  %741 = vrot.lane.b32.xlu0 %v735_v27, %s1829_s3  ;;  %v739_v46 = vmul.f32 %v737_v45, %v735_v27 }
 0xc16   :  { %v812_v31 = vmul.f32 %v807_v28, %v1919_v16  ;;  %v1639_v35 = vpop.f32.mrb[23].mxu0 }
 0xc18   :  { %1767 = vtanh.f32 %v812_v31 }
 0xc22   :  { %v1768_v37 = vpop.eup %1767 }
 0xc23   :  { %v814_v38 = vmul.f32 %v1768_v37, %v1919_v16 }
 0xc25   :  { %v815_v39 = vadd.f32 %v814_v38, %v1923_v24 }
 0xc27   :  { %818 = vrot.lane.b32.xlu1 %v815_v39, %s1829_s3  ;;  %v816_v49 = vmul.f32 %v815_v39, %v2088_v60 }
 0xc87   :  { %v742_v40 = vpop.permute.xlu0 %741 }
 0xc88   :  { %v744_v41 = vmul.f32 %v742_v40, %v735_v27 }
 0xc8a   :  { %746 = vrot.lane.b32.xlu0 %v744_v41, %s1830_s12 }
 0xc99   :  { %v819_v42 = vpop.permute.xlu1 %818 }
 0xc9a   :  { %v821_v43 = vmul.f32 %v819_v42, %v815_v39 }
 0xc9c   :  { %823 = vrot.lane.b32.xlu1 %v821_v43, %s1830_s12 }
 0xcfc   :  { %v747_v11 = vpop.permute.xlu0 %746 }
 0xcfd   :  { %v2127_v47 = vadd.f32 %v747_v11, %v739_v46 }
 0xcff   :  { %1769 = vtanh.f32 %v2127_v47 }
 0xd09   :  { %v1770_v48 = vpop.eup %1769 }
 0xd0a   :  { %752 = vrot.lane.b32.xlu0 %v1770_v48, %s1829_s3 }
 0xd0e   :  { %v824_v50 = vpop.permute.xlu1 %823 }
 0xd0f   :  { %v2132_v51 = vadd.f32 %v824_v50, %v816_v49 }
 0xd11   :  { %1771 = vtanh.f32 %v2132_v51 }
 0xd1b   :  { %v1772_v52 = vpop.eup %1771 }
 0xd1c   :  { %829 = vrot.lane.b32.xlu1 %v1772_v52, %s1829_s3 }
 0xd7c   :  { %v753_v53 = vpop.permute.xlu0 %752 }
 0xd7d   :  { %v755_v54 = vmul.f32 %v753_v53, %v735_v27  ;;  %v889_v27 = vrot.slane %v2127_v47, 6 }
 0xd7f   :  { %v833_v55 = vpack.c.bf16 %v755_v54, %v755_v54  ;;  %909 = vrot.lane.b32.xlu1 %v755_v54, %s1830_s12 }
 0xd81   :  { %835 = vrot.lane.b32.xlu0 %v833_v55, %s1830_s12 }
 0xd8e   :  { %v830_v56 = vpop.permute.xlu1 %829 }
 0xd8f   :  { %v832_v57 = vmul.f32 %v830_v56, %v815_v39 }
 0xd91   :  { %913 = vrot.lane.b32.xlu0 %v832_v57, %s1829_s3 }
 0xdf1   :  { %v910_v59 = vpop.permute.xlu1 %909 }
 0xdf3   :  { %v836_v58 = vpop.permute.xlu0 %835 }
 0xdf4   :  { %1645 = vmatmul.mubr.msk.bf16.vlgmr.msra.gmra.mrb[16].mxu1 %vm135_vm5, %v836_v58 }
 0xdf5   :  { %1649 = vmatpush3.bf16.msra.mxu1 %v1935_v32  ;;  %1656 = vmatprep.mubr.msk.bf16.mxu1 %vm1826_vm0, %v1825_v1 }
 0xdf6   :  { %1650 = vmatprep.subr.bf16.mxu1 %v1825_v1 }
 0xdf9   :  { %1651 = vmatpush3.bf16.msra.mxu1 %v1941_v33 }
 0xdfa   :  { %1652 = vmatprep.subr.bf16.mxu1 %v1825_v1 }
 0xdfd   :  { %1653 = vmatpush3.bf16.msra.mxu1 %v1948_v34 }
 0xdfe   :  { %1654 = vmatprep.subr.bf16.mxu1 %v1825_v1 }
 0xe01   :  { %1655 = vmatpush3.bf16.msra.mxu1 %v1957_v36 }
 0xe02   :  { %1680 = vmatprep.subr.bf16.mxu1 %v1825_v1 }
 0xe03   :  { %v914_v60 = vpop.permute.xlu0 %913 }
 0xe04   :  { %v916_v61 = vsel %vm135_vm5, %v910_v59, %v914_v60 }
 0xe05   :  { %v917_v62 = vpack.c.bf16 %v916_v61, %v916_v61 }
 0xe07   :  { %1657 = vmatmul.mubr.msk.bf16.vlgmr.msra.gmra.mrb[20].mxu1 %vm312_vm6, %v917_v62 }
 0xe08   :  { %1681 = vmatpush3.bf16.msra.mxu1 %v1885_v2  ;;  %1684 = vmatprep.mubr.msk.bf16.mxu1 %vm1826_vm0, %v1825_v1 }
 0xe09   :  { %1682 = vmatprep.subr.bf16.mxu1 %v1825_v1 }
 0xe0c   :  { %1683 = vmatpush3.bf16.msra.mxu1 %v1896_v4 }
 0xe0d   :  { %1688 = vmatprep.subr.bf16.mxu1 %v1825_v1 }
 0xec7   :  { %v874_v63 = vpop.f32.mrb[16].mxu1 }
 0xec8   :  { %v881_v0 = vrot.slane %v874_v63, 6  ;;  %v1646_v3 = vpop.f32.mrb[17].mxu1 }
 0xec9   :  { %v877_v5 = vpop.f32.mrb[18].mxu1 }
 0xeca   :  { %v883_v6 = vadd.f32 %v881_v0, %v1917_v13  ;;  %v1647_v7 = vpop.f32.mrb[19].mxu1 }
 0xecc   :  { %v884_v8 = vmul.f32 %v883_v6, %v1919_v16 }
 0xece   :  { %1773 = vtanh.f32 %v884_v8 }
 0xed8   :  { %v1774_v2 = vpop.eup %1773 }
 0xed9   :  { %v886_v9 = vmul.f32 %v1774_v2, %v1919_v16 }
 0xeda   :  { %v955_v10 = vpop.f32.mrb[20].mxu1 }
 0xedb   :  { %v956_v14 = vadd.f32 %v1981_v44, %v955_v10  ;;  %v1658_v15 = vpop.f32.mrb[21].mxu1  ;;  %v887_v4 = vadd.f32 %v886_v9, %v1923_v24 }
 0xedc   :  { %v958_v17 = vpop.f32.mrb[22].mxu1 }
 0xedd   :  { %v961_v12 = vmul.f32 %v956_v14, %v1919_v16  ;;  %v1659_v18 = vpop.f32.mrb[23].mxu1  ;;  %893 = vrot.lane.b32.xlu1 %v887_v4, %s1829_s3  ;;  %v891_v28 = vmul.f32 %v889_v27, %v887_v4 }
 0xedf   :  { %1775 = vtanh.f32 %v961_v12 }
 0xee9   :  { %v1776_v19 = vpop.eup %1775 }
 0xeea   :  { %v963_v20 = vmul.f32 %v1776_v19, %v1919_v16 }
 0xeec   :  { %v964_v21 = vadd.f32 %v963_v20, %v1923_v24 }
 0xeee   :  { %967 = vrot.lane.b32.xlu0 %v964_v21, %s1829_s3  ;;  %v965_v35 = vmul.f32 %v964_v21, %v2132_v51 }
 0xf4f   :  { %v894_v22 = vpop.permute.xlu1 %893 }
 0xf50   :  { %v896_v23 = vmul.f32 %v894_v22, %v887_v4 }
 0xf52   :  { %898 = vrot.lane.b32.xlu1 %v896_v23, %s1830_s12 }
 0xf60   :  { %v968_v25 = vpop.permute.xlu0 %967 }
 0xf61   :  { %v970_v26 = vmul.f32 %v968_v25, %v964_v21 }
 0xf63   :  { %972 = vrot.lane.b32.xlu0 %v970_v26, %s1830_s12 }
 0xfc4   :  { %v899_v29 = vpop.permute.xlu1 %898 }
 0xfc5   :  { %v2171_v30 = vadd.f32 %v899_v29, %v891_v28 }
 0xfc7   :  { %1777 = vtanh.f32 %v2171_v30  ;;  %v1039_v17 = vrot.slane %v2171_v30, 6 }
 0xfd1   :  { %v1778_v31 = vpop.eup %1777 }
 0xfd2   :  { %904 = vrot.lane.b32.xlu1 %v1778_v31, %s1829_s3 }
 0xfd5   :  { %v973_v37 = vpop.permute.xlu0 %972 }
 0xfd6   :  { %v2176_v38 = vadd.f32 %v973_v37, %v965_v35 }
 0xfd8   :  { %1779 = vtanh.f32 %v2176_v38 }
 0xfe2   :  { %v1780_v39 = vpop.eup %1779 }
 0xfe3   :  { %978 = vrot.lane.b32.xlu0 %v1780_v39, %s1829_s3 }
0x1044   :  { %v905_v40 = vpop.permute.xlu1 %904 }
0x1045   :  { %v907_v41 = vmul.f32 %v905_v40, %v887_v4 }
0x1047   :  { %v982_v42 = vpack.c.bf16 %v907_v41, %v907_v41  ;;  %1059 = vrot.lane.b32.xlu0 %v907_v41, %s1830_s12 }
0x1049   :  { %v984_v43 = vrot.slane %v982_v42, 1 }
0x104b   :  { %985 = vrot.lane.b32.xlu1 %v984_v43, %s1830_s12 }
0x1055   :  { %v979_v45 = vpop.permute.xlu0 %978 }
0x1056   :  { %v981_v46 = vmul.f32 %v979_v45, %v964_v21 }
0x1058   :  { %v1063_v11 = vrot.slane %v981_v46, 6 }
0x105a   :  { %1064 = vrot.lane.b32.xlu1 %v1063_v11, %s1829_s3 }
0x10b9   :  { %v1060_v48 = vpop.permute.xlu0 %1059 }
0x10bd   :  { %v986_v47 = vpop.permute.xlu1 %985 }
0x10be   :  { %1665 = vmatmul.mubr.msk.bf16.vlgmr.msra.gmra.mrb[24].mxu0 %vm135_vm5, %v986_v47 }
0x10bf   :  { %1669 = vmatpush3.bf16.msra.mxu0 %v1935_v32  ;;  %1676 = vmatprep.mubr.msk.bf16.mxu0 %vm1826_vm0, %v1825_v1 }
0x10c0   :  { %1670 = vmatprep.subr.bf16.mxu0 %v1825_v1 }
0x10c3   :  { %1671 = vmatpush3.bf16.msra.mxu0 %v1941_v33 }
0x10c4   :  { %1672 = vmatprep.subr.bf16.mxu0 %v1825_v1 }
0x10c7   :  { %1673 = vmatpush3.bf16.msra.mxu0 %v1948_v34 }
0x10c8   :  { %1674 = vmatprep.subr.bf16.mxu0 %v1825_v1 }
0x10cb   :  { %1675 = vmatpush3.bf16.msra.mxu0 %v1957_v36 }
0x10cc   :  { %v1065_v49 = vpop.permute.xlu1 %1064  ;;  %1700 = vmatprep.subr.bf16.mxu0 %v1825_v1 }
0x10cd   :  { %v1067_v50 = vsel %vm135_vm5, %v1060_v48, %v1065_v49 }
0x10ce   :  { %v1068_v51 = vpack.c.bf16 %v1067_v50, %v1067_v50 }
0x10d0   :  { %v1070_v52 = vrot.slane %v1068_v51, 1 }
0x10d2   :  { %1677 = vmatmul.mubr.msk.bf16.vlgmr.msra.gmra.mrb[28].mxu0 %vm312_vm6, %v1070_v52 }
0x10d3   :  { %1701 = vmatpush3.bf16.msra.mxu0 %v1935_v32  ;;  %1708 = vmatprep.mubr.msk.bf16.mxu0 %vm1826_vm0, %v1825_v1 }
0x10d4   :  { %1702 = vmatprep.subr.bf16.mxu0 %v1825_v1 }
0x10d7   :  { %1703 = vmatpush3.bf16.msra.mxu0 %v1941_v33 }
0x10d8   :  { %1704 = vmatprep.subr.bf16.mxu0 %v1825_v1 }
0x10db   :  { %1705 = vmatpush3.bf16.msra.mxu0 %v1948_v34 }
0x10dc   :  { %1706 = vmatprep.subr.bf16.mxu0 %v1825_v1 }
0x10df   :  { %1707 = vmatpush3.bf16.msra.mxu0 %v1957_v36 }
0x1191   :  { %v1024_v53 = vpop.f32.mrb[24].mxu0 }
0x1192   :  { %v1031_v54 = vrot.slane %v1024_v53, 4  ;;  %v1666_v55 = vpop.f32.mrb[25].mxu0 }
0x1193   :  { %v1027_v56 = vpop.f32.mrb[26].mxu0 }
0x1194   :  { %v1033_v57 = vadd.f32 %v1031_v54, %v1917_v13  ;;  %v1667_v58 = vpop.f32.mrb[27].mxu0 }
0x1196   :  { %v1034_v59 = vmul.f32 %v1033_v57, %v1919_v16 }
0x1198   :  { %1781 = vtanh.f32 %v1034_v59 }
0x11a2   :  { %v1782_v60 = vpop.eup %1781 }
0x11a3   :  { %v1036_v61 = vmul.f32 %v1782_v60, %v1919_v16 }
0x11a5   :  { %v1108_v62 = vpop.f32.mrb[28].mxu0  ;;  %v1037_v63 = vadd.f32 %v1036_v61, %v1923_v24 }
0x11a6   :  { %v1109_v0 = vadd.f32 %v1981_v44, %v1108_v62  ;;  %v1678_v3 = vpop.f32.mrb[29].mxu0 }
0x11a7   :  { %v1111_v5 = vpop.f32.mrb[30].mxu0  ;;  %1043 = vrot.lane.b32.xlu0 %v1037_v63, %s1829_s3  ;;  %v1041_v12 = vmul.f32 %v1039_v17, %v1037_v63 }
0x11a8   :  { %v1114_v6 = vmul.f32 %v1109_v0, %v1919_v16  ;;  %v1679_v7 = vpop.f32.mrb[31].mxu0 }
0x11aa   :  { %1783 = vtanh.f32 %v1114_v6 }
0x11b4   :  { %v1784_v8 = vpop.eup %1783 }
0x11b5   :  { %v1116_v2 = vmul.f32 %v1784_v8, %v1919_v16 }
0x11b7   :  { %v1117_v9 = vadd.f32 %v1116_v2, %v1923_v24 }
0x11b9   :  { %1120 = vrot.lane.b32.xlu1 %v1117_v9, %s1829_s3  ;;  %v1118_v21 = vmul.f32 %v1117_v9, %v2176_v38 }
0x1219   :  { %v1044_v10 = vpop.permute.xlu0 %1043 }
0x121a   :  { %v1046_v14 = vmul.f32 %v1044_v10, %v1037_v63 }
0x121c   :  { %1048 = vrot.lane.b32.xlu0 %v1046_v14, %s1830_s12 }
0x122b   :  { %v1121_v15 = vpop.permute.xlu1 %1120 }
0x122c   :  { %v1123_v4 = vmul.f32 %v1121_v15, %v1117_v9 }
0x122e   :  { %1125 = vrot.lane.b32.xlu1 %v1123_v4, %s1830_s12 }
0x128e   :  { %v1049_v18 = vpop.permute.xlu0 %1048 }
0x128f   :  { %v2218_v19 = vadd.f32 %v1049_v18, %v1041_v12 }
0x1291   :  { %1785 = vtanh.f32 %v2218_v19  ;;  %v1192_v61 = vrot.slane %v2218_v19, 6 }
0x129b   :  { %v1786_v20 = vpop.eup %1785 }
0x129c   :  { %1054 = vrot.lane.b32.xlu0 %v1786_v20, %s1829_s3 }
0x12a0   :  { %v1126_v22 = vpop.permute.xlu1 %1125 }
0x12a1   :  { %v2223_v23 = vadd.f32 %v1126_v22, %v1118_v21 }
0x12a3   :  { %1787 = vtanh.f32 %v2223_v23 }
0x12ad   :  { %v1788_v25 = vpop.eup %1787 }
0x12ae   :  { %1131 = vrot.lane.b32.xlu1 %v1788_v25, %s1829_s3 }
0x130e   :  { %v1055_v26 = vpop.permute.xlu0 %1054 }
0x130f   :  { %v1057_v27 = vmul.f32 %v1055_v26, %v1037_v63 }
0x1311   :  { %v1135_v28 = vpack.c.bf16 %v1057_v27, %v1057_v27  ;;  %1212 = vrot.lane.b32.xlu1 %v1057_v27, %s1830_s12 }
0x1313   :  { %v1137_v29 = vrot.slane %v1135_v28, 2 }
0x1315   :  { %1138 = vrot.lane.b32.xlu0 %v1137_v29, %s1830_s12 }
0x1320   :  { %v1132_v30 = vpop.permute.xlu1 %1131 }
0x1321   :  { %v1134_v31 = vmul.f32 %v1132_v30, %v1117_v9 }
0x1323   :  { %v1216_v35 = vrot.slane %v1134_v31, 4 }
0x1325   :  { %1217 = vrot.lane.b32.xlu0 %v1216_v35, %s1829_s3 }
0x1383   :  { %v1213_v38 = vpop.permute.xlu1 %1212 }
0x1387   :  { %v1139_v37 = vpop.permute.xlu0 %1138 }
0x1388   :  { %1685 = vmatmul.mubr.msk.bf16.vlgmr.msra.gmra.mrb[24].mxu1 %vm135_vm5, %v1139_v37 }
0x1389   :  { %1689 = vmatpush3.bf16.msra.mxu1 %v1935_v32  ;;  %1696 = vmatprep.mubr.msk.bf16.mxu1 %vm1826_vm0, %v1825_v1 }
0x138a   :  { %1690 = vmatprep.subr.bf16.mxu1 %v1825_v1 }
0x138d   :  { %1691 = vmatpush3.bf16.msra.mxu1 %v1941_v33 }
0x138e   :  { %1692 = vmatprep.subr.bf16.mxu1 %v1825_v1 }
0x1391   :  { %1693 = vmatpush3.bf16.msra.mxu1 %v1948_v34 }
0x1392   :  { %1694 = vmatprep.subr.bf16.mxu1 %v1825_v1 }
0x1395   :  { %1695 = vmatpush3.bf16.msra.mxu1 %v1957_v36 }
0x1396   :  { %1712 = vmatprep.subr.bf16.mxu1 %v1825_v1 }
0x1397   :  { %v1218_v39 = vpop.permute.xlu0 %1217 }
0x1398   :  { %v1220_v32 = vsel %vm135_vm5, %v1213_v38, %v1218_v39  ;;  %v1735_v38 = vld [vmem:[%s2302_s6] sm:$0xff]  }
0x1399   :  { %v1221_v40 = vpack.c.bf16 %v1220_v32, %v1220_v32 }
0x139b   :  { %v1223_v41 = vrot.slane %v1221_v40, 2 }
0x139d   :  { %1697 = vmatmul.mubr.msk.bf16.vlgmr.msra.gmra.mrb[28].mxu1 %vm312_vm6, %v1223_v41 }
0x139e   :  { %1716 = vmatprep.mubr.msk.bf16.mxu1 %vm1826_vm0, %v1825_v1  ;;  %1713 = vmatpush3.bf16.msra.mxu1 %v1735_v38 }
0x139f   :  { %1714 = vmatprep.subr.bf16.mxu1 %v1825_v1 }
0x145b   :  { %v1177_v33 = vpop.f32.mrb[24].mxu1 }
0x145c   :  { %v1184_v42 = vrot.slane %v1177_v33, 2  ;;  %v1686_v34 = vpop.f32.mrb[25].mxu1 }
0x145d   :  { %v1180_v43 = vpop.f32.mrb[26].mxu1 }
0x145e   :  { %v1186_v45 = vadd.f32 %v1184_v42, %v1917_v13  ;;  %v1687_v36 = vpop.f32.mrb[27].mxu1  ;;  %v1473_v42 = vld [vmem:[%s2303_s7] ss:$0 sm:$0xff] }
0x1460   :  { %v1187_v46 = vmul.f32 %v1186_v45, %v1919_v16 }
0x1462   :  { %1789 = vtanh.f32 %v1187_v46 }
0x146c   :  { %v1790_v11 = vpop.eup %1789 }
0x146d   :  { %v1189_v47 = vmul.f32 %v1790_v11, %v1919_v16 }
0x146f   :  { %v1190_v48 = vadd.f32 %v1189_v47, %v1923_v24 }
0x1470   :  { %v1261_v49 = vpop.f32.mrb[28].mxu1 }
0x1471   :  { %v1262_v50 = vadd.f32 %v1981_v44, %v1261_v49  ;;  %v1698_v51 = vpop.f32.mrb[29].mxu1  ;;  %1196 = vrot.lane.b32.xlu0 %v1190_v48, %s1829_s3  ;;  %v1194_v62 = vmul.f32 %v1192_v61, %v1190_v48 }
0x1472   :  { %v1264_v52 = vpop.f32.mrb[30].mxu1 }
0x1473   :  { %v1267_v53 = vmul.f32 %v1262_v50, %v1919_v16  ;;  %v1699_v54 = vpop.f32.mrb[31].mxu1 }
0x1475   :  { %1791 = vtanh.f32 %v1267_v53 }
0x147f   :  { %v1792_v13 = vpop.eup %1791 }
0x1480   :  { %v1269_v55 = vmul.f32 %v1792_v13, %v1919_v16 }
0x1482   :  { %v1270_v56 = vadd.f32 %v1269_v55, %v1923_v24 }
0x1484   :  { %1273 = vrot.lane.b32.xlu1 %v1270_v56, %s1829_s3  ;;  %v1271_v5 = vmul.f32 %v1270_v56, %v2223_v23 }
0x14e3   :  { %v1197_v57 = vpop.permute.xlu0 %1196 }
0x14e4   :  { %v1199_v58 = vmul.f32 %v1197_v57, %v1190_v48 }
0x14e6   :  { %1201 = vrot.lane.b32.xlu0 %v1199_v58, %s1830_s12 }
0x14f6   :  { %v1274_v59 = vpop.permute.xlu1 %1273 }
0x14f7   :  { %v1276_v60 = vmul.f32 %v1274_v59, %v1270_v56 }
0x14f9   :  { %1278 = vrot.lane.b32.xlu1 %v1276_v60, %s1830_s12 }
0x1558   :  { %v1202_v63 = vpop.permute.xlu0 %1201 }
0x1559   :  { %v1204_v0 = vadd.f32 %v1202_v63, %v1194_v62 }
0x155b   :  { %1793 = vtanh.f32 %v1204_v0 }
0x1565   :  { %v1794_v3 = vpop.eup %1793 }
0x1566   :  { %1207 = vrot.lane.b32.xlu0 %v1794_v3, %s1829_s3 }
0x156b   :  { %v1279_v6 = vpop.permute.xlu1 %1278 }
0x156c   :  { %v1281_v7 = vadd.f32 %v1279_v6, %v1271_v5 }
0x156e   :  { %1795 = vtanh.f32 %v1281_v7 }
0x1578   :  { %v1796_v8 = vpop.eup %1795 }
0x1579   :  { %1284 = vrot.lane.b32.xlu1 %v1796_v8, %s1829_s3 }
0x15d8   :  { %v1208_v2 = vpop.permute.xlu0 %1207 }
0x15d9   :  { %v1210_v9 = vmul.f32 %v1208_v2, %v1190_v48 }
0x15db   :  { %1289 = vrot.lane.b32.xlu1 %v1210_v9, %s1830_s12 }
0x15eb   :  { %v1285_v10 = vpop.permute.xlu1 %1284 }
0x15ec   :  { %v1287_v14 = vmul.f32 %v1285_v10, %v1270_v56 }
0x15ee   :  { %v1293_v15 = vrot.slane %v1287_v14, 2 }
0x15f0   :  { %1294 = vrot.lane.b32.xlu0 %v1293_v15, %s1829_s3 }
0x164d   :  { %v1290_v4 = vpop.permute.xlu1 %1289 }
0x1662   :  { %v1295_v17 = vpop.permute.xlu0 %1294 }
0x1663   :  { %v1297_v12 = vsel %vm135_vm5, %v1290_v4, %v1295_v17 }
0x1664   :  { %v1298_v18 = vpack.c.bf16 %v1297_v12, %v1297_v12 }
0x1666   :  { %v1300_v19 = vrot.slane %v1298_v18, 3 }
0x1668   :  { %1709 = vmatmul.mubr.msk.bf16.vlgmr.msra.gmra.mrb[32].mxu0 %vm312_vm6, %v1300_v19 }
0x173b   :  { %v1338_v20 = vpop.f32.mrb[32].mxu0 }
0x173c   :  { %v1339_v21 = vadd.f32 %v1981_v44, %v1338_v20  ;;  %v1710_v22 = vpop.f32.mrb[33].mxu0 }
0x173d   :  { %v1341_v23 = vpop.f32.mrb[34].mxu0 }
0x173e   :  { %v1344_v25 = vmul.f32 %v1339_v21, %v1919_v16  ;;  %v1711_v26 = vpop.f32.mrb[35].mxu0 }
0x1740   :  { %1797 = vtanh.f32 %v1344_v25 }
0x174a   :  { %v1798_v27 = vpop.eup %1797 }
0x174b   :  { %v1346_v28 = vmul.f32 %v1798_v27, %v1919_v16  ;;  %v1736_v16 = vld [vmem:[%s2302_s6 + $0x8] sm:$0xff]   ;;  %s1831_s6 = smov [#allocation2]  }
0x174c   :  { %1715 = vmatpush3.bf16.msra.mxu1 %v1736_v16  ;;  %s1439_s27 = sshll.u32 %s1831_s6, 4  ;;  %s1440_s27 = int_to_ptr.vmem [resolvable:$true] %s1439_s27 }
0x174d   :  { %v1347_v29 = vadd.f32 %v1346_v28, %v1923_v24  ;;  %s1801_s28 = scalar_lea.vmem %s1440_s27, 32  ;;  %p1806_p1 = scmp.lt.s32.totalorder %s1440_s27, %s1440_s27 }
0x174e   :  { %p1802_p0 = scmp.ne.s32.totalorder %s1440_s27, %s1801_s28  ;;  %p1807_p2 = scmp.lt.s32.totalorder %s1801_s28, %s1801_s28 }
0x174f   :  { %1350 = vrot.lane.b32.xlu1 %v1347_v29, %s1829_s3  ;;  %v1348_v35 = vmul.f32 %v1347_v29, %v1281_v7 }
0x1750   :  { %p1808_p3 = por %p1807_p2, %p1806_p1 }
0x1752   :  { %p1809_p4 = pnand %p1808_p3, %p1802_p0 }
0x17c1   :  { %v1351_v30 = vpop.permute.xlu1 %1350 }
0x17c2   :  { %v1353_v31 = vmul.f32 %v1351_v30, %v1347_v29 }
0x17c4   :  { %1355 = vrot.lane.b32.xlu0 %v1353_v31, %s1830_s12 }
0x1836   :  { %v1356_v37 = vpop.permute.xlu0 %1355 }
0x1837   :  { %v1358_v44 = vadd.f32 %v1356_v37, %v1348_v35 }
0x1839   :  { %1799 = vtanh.f32 %v1358_v44 }
0x1843   :  { %v1800_v24 = vpop.eup %1799 }
0x1844   :  { %1361 = vrot.lane.b32.xlu1 %v1800_v24, %s1829_s3 }
0x18b6   :  { %v1362_v39 = vpop.permute.xlu1 %1361 }
0x18b7   :  { %v1364_v32 = vmul.f32 %v1362_v39, %v1347_v29 }
0x18b9   :  { %v1365_v40 = vmax.f32 %v1364_v32, 0.0 }
0x18bb   :  { %v1366_v41 = vpack.c.bf16 %v1365_v40, %v1365_v40 }
0x18bd   :  { %1374 = vrot.lane.b32.xlu0 %v1366_v41, %s1830_s12 }
0x192f   :  { %v1375_v33 = vpop.permute.xlu0 %1374 }
0x1930   :  { %1717 = vmatmul.mubr.msk.bf16.vlgmr.msra.gmra.mrb[32].mxu1 %vm135_vm5, %v1375_v33 }
0x1a03   :  { %v1425_v1 = vpop.f32.mrb[32].mxu1 }
0x1a04   :  { %v1426_v34 = vadd.f32 %v1473_v42, %v1425_v1  ;;  %v1718_v43 = vpop.f32.mrb[33].mxu1 }
0x1a05   :  { %v1428_v45 = vpop.f32.mrb[34].mxu1 }
0x1a06   :  { %v1719_v36 = vpop.f32.mrb[35].mxu1  ;;  %1432 = vst.msk [vmem:[#allocation2] sm:$0x3] %vm1431_vm7, %v1426_v34 }
0x1a07   :  { %1812 = shalt.err (!%p1809_p4)
}
0x1a08   :  { %s1813_s7 = scalar_lea.hbm %s2304_s8, 32 }
0x1a09   :  { %p1814_p5 = scmp.ne.s32.totalorder %s2304_s8, %s1813_s7  ;;  %p1817_p6 = scmp.lt.u32.totalorder %s1813_s7, %s2304_s8 }
0x1a0b   :  { %p1819_p7 = pnand %p1817_p6, %p1814_p5 }
0x1a0d   :  { %1822 = shalt.err (!%p1819_p7)
}
0x1a0e   :  { %1442 = dma.vmem_to_hbm [thread:$0]  %s1440_s27, 32, %s2304_s8, [#allocation3]  }
0x1a0f   :  { %1823 = dma.done.wait [#allocation3], 32  }
0x1a10   :  { %1824 = vsyncadd [#allocation3], 4294967264 }
0x1a11   :  { %1446 = vsyncpa [#allocation3], 1 }

</bundles_post_ra>
